<compile_context>
chip_gen: v5e
topology: v5e:2x2
jax: 0.10.0
libtpu: 0.0.40
codegen_flags: <defaults>
</compile_context>

<pallas_src>
import math

import jax
import jax.numpy as jnp
from jax.experimental import pallas as pl
from jax.experimental.pallas import tpu as pltpu  # noqa: F401  (kept for TPU-specific tuning hooks)

# ----------------------------- hyper-parameters -----------------------------
SEG_NUM = 1
BUS_NUM = 0
NUM_WORDS = 8          # tokens per segment (S)
D_MODEL = 32           # word_embedding_dim
N_HEADS = 2            # num_attention_heads
D_K = 20               # hard-coded in MultiHeadAttention(...)
D_V = 20
ATT_DIM = N_HEADS * D_V            # 40
NEWS_QUERY_DIM = 16    # news_query_vector_dim
USER_QUERY_DIM = 16    # user_query_vector_dim
NEWS_DIM = 16
VOCAB = 50
CATEGORY_DICT_SIZE = 10
N_NEWS = 4             # batch of news to encode
N_USERS = 2            # user batch
HIST_LEN = 5           # user history length
NPRATIO = 2            # negatives per position
ADD_PAD = True
USE_PAD = False


# ============================== Pallas kernels ===============================

def news_encoder_kernel(xf_ref, cmask_ref, tmask_ref, pool_ref,
                        wqkv_ref, bqkv_ref,
                        ta_w1_ref, ta_b1_ref, ta_w2_ref, ta_b2_ref,
                        cat_ref,
                        fa_w1_ref, fa_b1_ref, fa_w2_ref, fa_b2_ref,
                        rd_w_ref, rd_b_ref,
                        o_ref):
    """Fused NewsEncoder for all N news in one block (no grid).

    xf:    (N*S, D_MODEL)   flattened token embeddings
    cmask: (N*S, N*S)       block-diagonal key mask (n==m) * token_mask[m, j]
    tmask: (N*S, 1)         token mask column for additive attention
    pool:  (N, N*S)         0/1 segment-sum matrix (row n selects news n's tokens)
    """
    xf = xf_ref[...]                                                     # (NS, D)
    cm = cmask_ref[...]                                                  # (NS, NS)

    # ---- fused QKV projection (1/sqrt(d_k) already folded into the Q part) ----
    qkv = jnp.dot(xf, wqkv_ref[...], preferred_element_type=jnp.float32) \
        + bqkv_ref[...]                                                  # (NS, 3*ATT_DIM)

    q_off = 0
    k_off = N_HEADS * D_K
    v_off = 2 * N_HEADS * D_K

    # ---- multi-head exp-norm attention, all news batched via block-diag mask ----
    ctx_parts = []
    for h in range(N_HEADS):
        qh = qkv[:, q_off + h * D_K: q_off + (h + 1) * D_K]              # (NS, D_K)
        kh = qkv[:, k_off + h * D_K: k_off + (h + 1) * D_K]              # (NS, D_K)
        vh = qkv[:, v_off + h * D_V: v_off + (h + 1) * D_V]              # (NS, D_V)
        s = jax.lax.dot_general(qh, kh, (((1,), (1,)), ((), ())),
                                preferred_element_type=jnp.float32)      # (NS, NS)
        s = jnp.exp(s) * cm                                              # exp-then-mask (as in PyTorch)
        inv = pl.reciprocal(jnp.sum(s, axis=-1, keepdims=True) + 1e-8, approx=True)
        ctx_parts.append(jnp.dot(s * inv, vh,
                                 preferred_element_type=jnp.float32))    # (NS, D_V)
    ctx = jnp.concatenate(ctx_parts, axis=-1)                            # (NS, ATT_DIM)

    # ---- token-level additive attention (segment sums via pool matmul) ----
    e = jnp.tanh(jnp.dot(ctx, ta_w1_ref[...],
                         preferred_element_type=jnp.float32) + ta_b1_ref[...])       # (NS, hq)
    logit = jnp.sum(e * ta_w2_ref[...], axis=-1, keepdims=True) + ta_b2_ref[...]     # (NS, 1)
    aw = jnp.exp(logit) * tmask_ref[...]                                              # (NS, 1)
    pooled = jnp.dot(pool_ref[...],
                     jnp.concatenate([ctx * aw, aw], axis=-1),
                     preferred_element_type=jnp.float32)                 # (N, ATT_DIM+1)
    num = pooled[:, :ATT_DIM]                                            # (N, ATT_DIM)
    den = pooled[:, ATT_DIM:ATT_DIM + 1] + 1e-8                          # (N, 1)
    tv = num * pl.reciprocal(den, approx=True)                           # (N, ATT_DIM)

    # ---- final additive attention over {text_vec, category_vec} (no mask) ----
    cat = cat_ref[...]                                                   # (N, ATT_DIM)

    def _fa_weight(x):
        ee = jnp.tanh(jnp.dot(x, fa_w1_ref[...],
                              preferred_element_type=jnp.float32) + fa_b1_ref[...])
        return jnp.exp(jnp.sum(ee * fa_w2_ref[...], axis=-1, keepdims=True)
                       + fa_b2_ref[...])                                 # (N, 1)

    a_t = _fa_weight(tv)
    a_c = _fa_weight(cat)
    inv_f = pl.reciprocal(a_t + a_c + 1e-8, approx=True)
    final_vec = (tv * a_t + cat * a_c) * inv_f                           # (N, ATT_DIM)

    # ---- reduce_dim linear ----
    o_ref[...] = jnp.dot(final_vec, rd_w_ref[...],
                         preferred_element_type=jnp.float32) + rd_b_ref[...]          # (N, NEWS_DIM)


def user_score_kernel(vec_ref, amask_ref, cand_ref, pmask_ref,
                      w1_ref, b1_ref, w2_ref, b2_ref, o_ref):
    """Fused UserEncoder._process_news + candidate scoring + masked CE loss.

    vec:   (B, L, D)     [pad_doc; history][:, :-1]
    amask: (B, G, L)     auto-regressive mask (already includes batch_mask term)
    cand:  (B, G, C, D)  [positive | negatives]
    pmask: (B, G, 1)     batch_mask[:, 1:]
    out:   (1, 1)        scalar loss
    """
    B, L, _ = vec_ref.shape
    G = amask_ref.shape[1]
    C = cand_ref.shape[2]

    w1 = w1_ref[...]
    b1 = b1_ref[...]
    w2 = w2_ref[...]
    b2 = b2_ref[0, 0]

    num = jnp.zeros((1, 1), jnp.float32)
    den = jnp.zeros((1, 1), jnp.float32)
    for b in range(B):                         # B=2, unrolled at trace time (no grid launches)
        v = vec_ref[b]                         # (L, D)
        am = amask_ref[b]                      # (G, L)

        # attention logits over history items
        e = jnp.tanh(jnp.dot(v, w1, preferred_element_type=jnp.float32) + b1)   # (L, hq)
        s = jnp.sum(e * w2, axis=1) + b2                                        # (L,)
        wl = jnp.broadcast_to(s[None, :], (G, L))                               # (G, L)
        wl = jnp.where(am == 0.0, -1e8, wl)
        wl = wl - jnp.max(wl, axis=-1, keepdims=True)
        ew = jnp.exp(wl)
        attn = ew * pl.reciprocal(jnp.sum(ew, axis=-1, keepdims=True), approx=True)
        uv = jnp.dot(attn, v, preferred_element_type=jnp.float32)               # (G, D)

        # candidate scoring + softmax + -log p(positive), kept lane-column shaped
        cb = cand_ref[b]                                                        # (G, C, D)
        logits = [jnp.sum(cb[:, c, :] * uv, axis=-1, keepdims=True)
                  for c in range(C)]                                            # C x (G, 1)
        mx = logits[0]
        for t in logits[1:]:
            mx = jnp.maximum(mx, t)
        exps = [jnp.exp(t - mx) for t in logits]
        denom = exps[0]
        for t in exps[1:]:
            denom = denom + t
        p0 = exps[0] * pl.reciprocal(denom, approx=True)                        # (G, 1)
        loss_b = -jnp.log(p0 + 1e-9)                                            # (G, 1)

        pm = pmask_ref[b]                                                       # (G, 1)
        num = num + jnp.sum(loss_b * pm, keepdims=True)
        den = den + jnp.sum(pm, keepdims=True)

    o_ref[...] = num / (den + 1e-9)


# ============================== model (JAX glue) =============================

def init_params(key):
    ks = jax.random.split(key, 16)
    n = lambda k, shape: jax.random.normal(k, shape, jnp.float32) * 0.1
    p = {}
    # bert stand-in token embedding
    p["tok_emb"] = n(ks[0], (VOCAB, D_MODEL))
    # MultiHeadAttention — fused QKV, stored (in, out); PyTorch Linear is x @ W.T
    wq = n(ks[1], (D_MODEL, N_HEADS * D_K)); bq = jnp.zeros((1, N_HEADS * D_K), jnp.float32)
    wk = n(ks[2], (D_MODEL, N_HEADS * D_K)); bk = jnp.zeros((1, N_HEADS * D_K), jnp.float32)
    wv = n(ks[3], (D_MODEL, N_HEADS * D_V)); bv = jnp.zeros((1, N_HEADS * D_V), jnp.float32)
    scale = 1.0 / math.sqrt(D_K)
    p["wqkv"] = jnp.concatenate([wq * scale, wk, wv], axis=1)   # 1/sqrt(d_k) folded into Wq
    p["bqkv"] = jnp.concatenate([bq * scale, bk, bv], axis=1)
    # TextEncoder additive attention
    p["ta_w1"] = n(ks[4], (ATT_DIM, NEWS_QUERY_DIM)); p["ta_b1"] = jnp.zeros((1, NEWS_QUERY_DIM), jnp.float32)
    p["ta_w2"] = n(ks[5], (1, NEWS_QUERY_DIM));       p["ta_b2"] = jnp.zeros((1, 1), jnp.float32)
    # category ElementEncoder (padding_idx=0 -> zero row)
    cat = n(ks[6], (CATEGORY_DICT_SIZE + 1, ATT_DIM))
    p["cat_emb"] = cat.at[0].set(0.0)
    # NewsEncoder final additive attention
    p["fa_w1"] = n(ks[7], (ATT_DIM, NEWS_QUERY_DIM)); p["fa_b1"] = jnp.zeros((1, NEWS_QUERY_DIM), jnp.float32)
    p["fa_w2"] = n(ks[8], (1, NEWS_QUERY_DIM));       p["fa_b2"] = jnp.zeros((1, 1), jnp.float32)
    # reduce_dim_linear
    p["rd_w"] = n(ks[9], (ATT_DIM, NEWS_DIM)); p["rd_b"] = jnp.zeros((1, NEWS_DIM), jnp.float32)
    # UserEncoder att_fc1 / att_fc2
    p["ua_w1"] = n(ks[10], (NEWS_DIM, USER_QUERY_DIM)); p["ua_b1"] = jnp.zeros((1, USER_QUERY_DIM), jnp.float32)
    p["ua_w2"] = n(ks[11], (1, USER_QUERY_DIM));        p["ua_b2"] = jnp.zeros((1, 1), jnp.float32)
    # pad_doc parameter, uniform(-1, 1)
    p["pad_doc"] = jax.random.uniform(ks[12], (1, NEWS_DIM), jnp.float32, -1.0, 1.0)
    return p


def news_encoder_forward(params, segments, token_masks, seg_masks, elements):
    """Single fused pallas_call for the whole NewsEncoder (seg_num=1, bus_num=0)."""
    del seg_masks  # unused when bus_num == 0
    tokens = segments[0]                                     # (N, S)
    tok_mask = token_masks[0].astype(jnp.float32)            # (N, S)
    N, S = tokens.shape

    # TODO(synk): external bert_model replaced by deterministic token-embedding stand-in.
    hidden = jnp.take(params["tok_emb"], tokens, axis=0)     # (N, S, D_MODEL)
    xf = hidden.reshape(N * S, D_MODEL)

    # block-diagonal key mask: query (n,i) attends key (m,j) iff n==m and token j valid
    news_id = jnp.repeat(jnp.arange(N), S)                   # (N*S,)
    cmask = (news_id[:, None] == news_id[None, :]).astype(jnp.float32) \
        * tok_mask.reshape(-1)[None, :]                      # (N*S, N*S)
    tmask_col = tok_mask.reshape(N * S, 1)                   # (N*S, 1)
    pool = (news_id[None, :] == jnp.arange(N)[:, None]).astype(jnp.float32)  # (N, N*S)

    cat_vec = jnp.take(params["cat_emb"], elements[:, 0], axis=0)            # (N, ATT_DIM)

    return pl.pallas_call(
        news_encoder_kernel,
        out_shape=jax.ShapeDtypeStruct((N, NEWS_DIM), jnp.float32),
    )(xf, cmask, tmask_col, pool,
      params["wqkv"], params["bqkv"],
      params["ta_w1"], params["ta_b1"], params["ta_w2"], params["ta_b2"],
      cat_vec,
      params["fa_w1"], params["fa_b1"], params["fa_w2"], params["fa_b2"],
      params["rd_w"], params["rd_b"])


def user_encoder_and_loss(params, log_vec, batch_mask, neg_vec):
    """Fused UserEncoder._process_news + scoring + masked CE (single pallas_call)."""
    B = log_vec.shape[0]
    min_log_length = 1
    vec = log_vec
    if ADD_PAD:
        pad = jnp.broadcast_to(params["pad_doc"], (B, NEWS_DIM))[:, None, :]
        vec = jnp.concatenate([pad, vec], axis=1)
        min_log_length += 1
    vec = vec[:, :-1, :]                                     # (B, L, NEWS_DIM)
    L = vec.shape[1]
    min_log_length = min(min_log_length, L)
    G = L + 1 - min_log_length

    rows = jnp.arange(G)[:, None]
    cols = jnp.arange(L)[None, :]
    autor_mask = (cols <= rows + (min_log_length - 1)).astype(jnp.float32)   # (G, L)
    if USE_PAD:
        auto_mask = jnp.broadcast_to(autor_mask[None], (B, G, L))
    else:
        auto_mask = autor_mask[None, :, :] * batch_mask[:, :G][:, :, None]   # (B, G, L)

    candidate = jnp.concatenate(
        [log_vec[:, 1:, :][:, :, None, :], neg_vec], axis=2)                 # (B, G, C, D)
    pos_mask = batch_mask[:, 1:][:, :, None]                                 # (B, G, 1)

    loss = pl.pallas_call(
        user_score_kernel,
        out_shape=jax.ShapeDtypeStruct((1, 1), jnp.float32),
    )(vec, auto_mask, candidate, pos_mask,
      params["ua_w1"], params["ua_b1"], params["ua_w2"], params["ua_b2"])
    return loss[0, 0]


@jax.jit
def model_bert_forward(params, segments, token_masks, seg_masks, elements,
                       cache_vec, batch_hist, batch_mask, batch_negs):
    encode_vecs = news_encoder_forward(params, segments, token_masks, seg_masks, elements)
    if cache_vec is not None:
        news_vecs = jnp.concatenate([params["pad_doc"], cache_vec, encode_vecs], axis=0)
    else:
        news_vecs = jnp.concatenate([params["pad_doc"], encode_vecs], axis=0)
    B, H = batch_hist.shape
    neg_vec = jnp.take(news_vecs, batch_negs.reshape(-1), axis=0).reshape(
        batch_negs.shape[0], batch_negs.shape[1], batch_negs.shape[2], -1)
    log_vec = jnp.take(news_vecs, batch_hist.reshape(-1), axis=0).reshape(B, H, -1)
    loss = user_encoder_and_loss(params, log_vec, batch_mask, neg_vec)
    return loss, encode_vecs


# ==================================== main ===================================

if __name__ == "__main__":
    root = jax.random.PRNGKey(0)
    kp, k1, k2, k3, k4 = jax.random.split(root, 5)
    params = init_params(kp)

    # inputs
    segments = tuple(
        jax.random.randint(jax.random.fold_in(k1, s), (N_NEWS, NUM_WORDS), 1, VOCAB)
        for s in range(SEG_NUM))
    seq_lens = jnp.array([NUM_WORDS, 6, 7, 5])[:, None]
    token_masks = tuple(
        (jnp.arange(NUM_WORDS)[None, :] < seq_lens).astype(jnp.float32)
        for _ in range(SEG_NUM))
    seg_masks = jnp.ones((N_NEWS, SEG_NUM), jnp.float32)
    elements = jax.random.randint(k2, (N_NEWS, 1), 0, CATEGORY_DICT_SIZE + 1)
    cache_vec = None
    batch_hist = jax.random.randint(k3, (N_USERS, HIST_LEN), 0, N_NEWS + 1)
    batch_mask = jnp.array([[1, 1, 1, 1, 0],
                            [1, 1, 1, 0, 0]], jnp.float32)
    batch_negs = jax.random.randint(k4, (N_USERS, HIST_LEN - 1, NPRATIO), 0, N_NEWS + 1)

    loss, encode_vecs = model_bert_forward(
        params, segments, token_masks, seg_masks, elements,
        cache_vec, batch_hist, batch_mask, batch_negs)

    jax.block_until_ready((loss, encode_vecs))
    assert encode_vecs.shape == (N_NEWS, NEWS_DIM)
    assert loss.shape == ()
    print("KERNEL_OK")
</pallas_src>

<mosaic_0001>
module attributes {stable_mosaic.version = 11 : i64} {
  func.func @news_encoder_kernel(%arg0: memref<32x32xf32, #tpu.memory_space<vmem>>, %arg1: memref<32x32xf32, #tpu.memory_space<vmem>>, %arg2: memref<32x1xf32, #tpu.memory_space<vmem>>, %arg3: memref<4x32xf32, #tpu.memory_space<vmem>>, %arg4: memref<32x120xf32, #tpu.memory_space<vmem>>, %arg5: memref<1x120xf32, #tpu.memory_space<vmem>>, %arg6: memref<40x16xf32, #tpu.memory_space<vmem>>, %arg7: memref<1x16xf32, #tpu.memory_space<vmem>>, %arg8: memref<1x16xf32, #tpu.memory_space<vmem>>, %arg9: memref<1x1xf32, #tpu.memory_space<vmem>>, %arg10: memref<4x40xf32, #tpu.memory_space<vmem>>, %arg11: memref<40x16xf32, #tpu.memory_space<vmem>>, %arg12: memref<1x16xf32, #tpu.memory_space<vmem>>, %arg13: memref<1x16xf32, #tpu.memory_space<vmem>>, %arg14: memref<1x1xf32, #tpu.memory_space<vmem>>, %arg15: memref<40x16xf32, #tpu.memory_space<vmem>>, %arg16: memref<1x16xf32, #tpu.memory_space<vmem>>, %arg17: memref<4x16xf32, #tpu.memory_space<vmem>>) attributes {dimension_semantics = [], scalar_prefetch = 0 : i64, scratch_operands = 0 : i64, tpu.core_type = #tpu.core_type<tc>} {
    %c0 = arith.constant 0 : index
    %c0_0 = arith.constant 0 : index
    %0 = vector.load %arg0[%c0, %c0_0] : memref<32x32xf32, #tpu.memory_space<vmem>>, vector<32x32xf32>
    %c0_1 = arith.constant 0 : index
    %c0_2 = arith.constant 0 : index
    %1 = vector.load %arg1[%c0_1, %c0_2] : memref<32x32xf32, #tpu.memory_space<vmem>>, vector<32x32xf32>
    %c0_3 = arith.constant 0 : index
    %c0_4 = arith.constant 0 : index
    %2 = vector.load %arg4[%c0_3, %c0_4] : memref<32x120xf32, #tpu.memory_space<vmem>>, vector<32x120xf32>
    %cst = arith.constant dense<0.000000e+00> : vector<32x120xf32>
    %3 = tpu.matmul %0, %2, %cst {dimension_numbers = #tpu.dot_dimension_numbers<[1], [0], [0], [1], [0, 0, 1, 1], [], []>} : vector<32x32xf32>, vector<32x120xf32>, vector<32x120xf32> -> vector<32x120xf32>
    %c0_5 = arith.constant 0 : index
    %c0_6 = arith.constant 0 : index
    %4 = vector.load %arg5[%c0_5, %c0_6] : memref<1x120xf32, #tpu.memory_space<vmem>>, vector<1x120xf32>
    %5 = vector.broadcast %4 : vector<1x120xf32> to vector<32x120xf32>
    %6 = arith.addf %3, %5 : vector<32x120xf32>
    %7 = vector.extract_strided_slice %6 {offsets = [0, 0], sizes = [32, 20], strides = [1, 1]} : vector<32x120xf32> to vector<32x20xf32>
    %8 = vector.extract_strided_slice %6 {offsets = [0, 40], sizes = [32, 20], strides = [1, 1]} : vector<32x120xf32> to vector<32x20xf32>
    %9 = vector.extract_strided_slice %6 {offsets = [0, 80], sizes = [32, 20], strides = [1, 1]} : vector<32x120xf32> to vector<32x20xf32>
    %cst_7 = arith.constant dense<0.000000e+00> : vector<32x32xf32>
    %10 = tpu.matmul %7, %8, %cst_7 {dimension_numbers = #tpu.dot_dimension_numbers<[1], [1], [0], [0], [0, 0, 1, 0], [], []>} : vector<32x20xf32>, vector<32x20xf32>, vector<32x32xf32> -> vector<32x32xf32>
    %11 = math.exp %10 : vector<32x32xf32>
    %12 = arith.mulf %11, %1 : vector<32x32xf32>
    %cst_8 = arith.constant dense<0.000000e+00> : vector<32xf32>
    %13 = vector.multi_reduction <add>, %12, %cst_8 [1] : vector<32x32xf32> to vector<32xf32>
    %14 = vector.shape_cast %13 : vector<32xf32> to vector<32x1xf32>
    %cst_9 = arith.constant 9.99999993E-9 : f32
    %15 = vector.broadcast %cst_9 : f32 to vector<32x1xf32>
    %16 = arith.addf %14, %15 : vector<32x1xf32>
    %17 = tpu.reciprocal %16 {approx = true} : vector<32x1xf32> -> vector<32x1xf32>
    %18 = vector.broadcast %17 : vector<32x1xf32> to vector<32x32xf32>
    %19 = arith.mulf %12, %18 : vector<32x32xf32>
    %cst_10 = arith.constant dense<0.000000e+00> : vector<32x20xf32>
    %20 = tpu.matmul %19, %9, %cst_10 {dimension_numbers = #tpu.dot_dimension_numbers<[1], [0], [0], [1], [0, 0, 1, 1], [], []>} : vector<32x32xf32>, vector<32x20xf32>, vector<32x20xf32> -> vector<32x20xf32>
    %21 = vector.extract_strided_slice %6 {offsets = [0, 20], sizes = [32, 20], strides = [1, 1]} : vector<32x120xf32> to vector<32x20xf32>
    %22 = vector.extract_strided_slice %6 {offsets = [0, 60], sizes = [32, 20], strides = [1, 1]} : vector<32x120xf32> to vector<32x20xf32>
    %23 = vector.extract_strided_slice %6 {offsets = [0, 100], sizes = [32, 20], strides = [1, 1]} : vector<32x120xf32> to vector<32x20xf32>
    %cst_11 = arith.constant dense<0.000000e+00> : vector<32x32xf32>
    %24 = tpu.matmul %21, %22, %cst_11 {dimension_numbers = #tpu.dot_dimension_numbers<[1], [1], [0], [0], [0, 0, 1, 0], [], []>} : vector<32x20xf32>, vector<32x20xf32>, vector<32x32xf32> -> vector<32x32xf32>
    %25 = math.exp %24 : vector<32x32xf32>
    %26 = arith.mulf %25, %1 : vector<32x32xf32>
    %cst_12 = arith.constant dense<0.000000e+00> : vector<32xf32>
    %27 = vector.multi_reduction <add>, %26, %cst_12 [1] : vector<32x32xf32> to vector<32xf32>
    %28 = vector.shape_cast %27 : vector<32xf32> to vector<32x1xf32>
    %cst_13 = arith.constant 9.99999993E-9 : f32
    %29 = vector.broadcast %cst_13 : f32 to vector<32x1xf32>
    %30 = arith.addf %28, %29 : vector<32x1xf32>
    %31 = tpu.reciprocal %30 {approx = true} : vector<32x1xf32> -> vector<32x1xf32>
    %32 = vector.broadcast %31 : vector<32x1xf32> to vector<32x32xf32>
    %33 = arith.mulf %26, %32 : vector<32x32xf32>
    %cst_14 = arith.constant dense<0.000000e+00> : vector<32x20xf32>
    %34 = tpu.matmul %33, %23, %cst_14 {dimension_numbers = #tpu.dot_dimension_numbers<[1], [0], [0], [1], [0, 0, 1, 1], [], []>} : vector<32x32xf32>, vector<32x20xf32>, vector<32x20xf32> -> vector<32x20xf32>
    %35 = tpu.concatenate %20, %34 in 1 : vector<32x20xf32>, vector<32x20xf32> -> vector<32x40xf32>
    %c0_15 = arith.constant 0 : index
    %c0_16 = arith.constant 0 : index
    %36 = vector.load %arg6[%c0_15, %c0_16] : memref<40x16xf32, #tpu.memory_space<vmem>>, vector<40x16xf32>
    %cst_17 = arith.constant dense<0.000000e+00> : vector<32x16xf32>
    %37 = tpu.matmul %35, %36, %cst_17 {dimension_numbers = #tpu.dot_dimension_numbers<[1], [0], [0], [1], [0, 0, 1, 1], [], []>} : vector<32x40xf32>, vector<40x16xf32>, vector<32x16xf32> -> vector<32x16xf32>
    %c0_18 = arith.constant 0 : index
    %c0_19 = arith.constant 0 : index
    %38 = vector.load %arg7[%c0_18, %c0_19] : memref<1x16xf32, #tpu.memory_space<vmem>>, vector<1x16xf32>
    %39 = vector.broadcast %38 : vector<1x16xf32> to vector<32x16xf32>
    %40 = arith.addf %37, %39 : vector<32x16xf32>
    %41 = math.tanh %40 : vector<32x16xf32>
    %c0_20 = arith.constant 0 : index
    %c0_21 = arith.constant 0 : index
    %42 = vector.load %arg8[%c0_20, %c0_21] : memref<1x16xf32, #tpu.memory_space<vmem>>, vector<1x16xf32>
    %43 = vector.broadcast %42 : vector<1x16xf32> to vector<32x16xf32>
    %44 = arith.mulf %41, %43 : vector<32x16xf32>
    %cst_22 = arith.constant dense<0.000000e+00> : vector<32xf32>
    %45 = vector.multi_reduction <add>, %44, %cst_22 [1] : vector<32x16xf32> to vector<32xf32>
    %46 = vector.shape_cast %45 : vector<32xf32> to vector<32x1xf32>
    %c0_23 = arith.constant 0 : index
    %c0_24 = arith.constant 0 : index
    %47 = vector.load %arg9[%c0_23, %c0_24] : memref<1x1xf32, #tpu.memory_space<vmem>>, vector<1x1xf32>
    %48 = vector.broadcast %47 : vector<1x1xf32> to vector<32x1xf32>
    %49 = arith.addf %46, %48 : vector<32x1xf32>
    %50 = math.exp %49 : vector<32x1xf32>
    %c0_25 = arith.constant 0 : index
    %c0_26 = arith.constant 0 : index
    %51 = vector.load %arg2[%c0_25, %c0_26] : memref<32x1xf32, #tpu.memory_space<vmem>>, vector<32x1xf32>
    %52 = arith.mulf %50, %51 : vector<32x1xf32>
    %c0_27 = arith.constant 0 : index
    %c0_28 = arith.constant 0 : index
    %53 = vector.load %arg3[%c0_27, %c0_28] : memref<4x32xf32, #tpu.memory_space<vmem>>, vector<4x32xf32>
    %54 = vector.broadcast %52 : vector<32x1xf32> to vector<32x40xf32>
    %55 = arith.mulf %35, %54 : vector<32x40xf32>
    %56 = tpu.concatenate %55, %52 in 1 : vector<32x40xf32>, vector<32x1xf32> -> vector<32x41xf32>
    %cst_29 = arith.constant dense<0.000000e+00> : vector<4x41xf32>
    %57 = tpu.matmul %53, %56, %cst_29 {dimension_numbers = #tpu.dot_dimension_numbers<[1], [0], [0], [1], [0, 0, 1, 1], [], []>} : vector<4x32xf32>, vector<32x41xf32>, vector<4x41xf32> -> vector<4x41xf32>
    %58 = vector.extract_strided_slice %57 {offsets = [0, 0], sizes = [4, 40], strides = [1, 1]} : vector<4x41xf32> to vector<4x40xf32>
    %59 = vector.extract_strided_slice %57 {offsets = [0, 40], sizes = [4, 1], strides = [1, 1]} : vector<4x41xf32> to vector<4x1xf32>
    %cst_30 = arith.constant 9.99999993E-9 : f32
    %60 = vector.broadcast %cst_30 : f32 to vector<4x1xf32>
    %61 = arith.addf %59, %60 : vector<4x1xf32>
    %62 = tpu.reciprocal %61 {approx = true} : vector<4x1xf32> -> vector<4x1xf32>
    %63 = vector.broadcast %62 : vector<4x1xf32> to vector<4x40xf32>
    %64 = arith.mulf %58, %63 : vector<4x40xf32>
    %c0_31 = arith.constant 0 : index
    %c0_32 = arith.constant 0 : index
    %65 = vector.load %arg10[%c0_31, %c0_32] : memref<4x40xf32, #tpu.memory_space<vmem>>, vector<4x40xf32>
    %c0_33 = arith.constant 0 : index
    %c0_34 = arith.constant 0 : index
    %66 = vector.load %arg11[%c0_33, %c0_34] : memref<40x16xf32, #tpu.memory_space<vmem>>, vector<40x16xf32>
    %cst_35 = arith.constant dense<0.000000e+00> : vector<4x16xf32>
    %67 = tpu.matmul %64, %66, %cst_35 {dimension_numbers = #tpu.dot_dimension_numbers<[1], [0], [0], [1], [0, 0, 1, 1], [], []>} : vector<4x40xf32>, vector<40x16xf32>, vector<4x16xf32> -> vector<4x16xf32>
    %c0_36 = arith.constant 0 : index
    %c0_37 = arith.constant 0 : index
    %68 = vector.load %arg12[%c0_36, %c0_37] : memref<1x16xf32, #tpu.memory_space<vmem>>, vector<1x16xf32>
    %69 = vector.broadcast %68 : vector<1x16xf32> to vector<4x16xf32>
    %70 = arith.addf %67, %69 : vector<4x16xf32>
    %71 = math.tanh %70 : vector<4x16xf32>
    %c0_38 = arith.constant 0 : index
    %c0_39 = arith.constant 0 : index
    %72 = vector.load %arg13[%c0_38, %c0_39] : memref<1x16xf32, #tpu.memory_space<vmem>>, vector<1x16xf32>
    %73 = vector.broadcast %72 : vector<1x16xf32> to vector<4x16xf32>
    %74 = arith.mulf %71, %73 : vector<4x16xf32>
    %cst_40 = arith.constant dense<0.000000e+00> : vector<4xf32>
    %75 = vector.multi_reduction <add>, %74, %cst_40 [1] : vector<4x16xf32> to vector<4xf32>
    %76 = vector.shape_cast %75 : vector<4xf32> to vector<4x1xf32>
    %c0_41 = arith.constant 0 : index
    %c0_42 = arith.constant 0 : index
    %77 = vector.load %arg14[%c0_41, %c0_42] : memref<1x1xf32, #tpu.memory_space<vmem>>, vector<1x1xf32>
    %78 = vector.broadcast %77 : vector<1x1xf32> to vector<4x1xf32>
    %79 = arith.addf %76, %78 : vector<4x1xf32>
    %80 = math.exp %79 : vector<4x1xf32>
    %c0_43 = arith.constant 0 : index
    %c0_44 = arith.constant 0 : index
    %81 = vector.load %arg11[%c0_43, %c0_44] : memref<40x16xf32, #tpu.memory_space<vmem>>, vector<40x16xf32>
    %cst_45 = arith.constant dense<0.000000e+00> : vector<4x16xf32>
    %82 = tpu.matmul %65, %81, %cst_45 {dimension_numbers = #tpu.dot_dimension_numbers<[1], [0], [0], [1], [0, 0, 1, 1], [], []>} : vector<4x40xf32>, vector<40x16xf32>, vector<4x16xf32> -> vector<4x16xf32>
    %c0_46 = arith.constant 0 : index
    %c0_47 = arith.constant 0 : index
    %83 = vector.load %arg12[%c0_46, %c0_47] : memref<1x16xf32, #tpu.memory_space<vmem>>, vector<1x16xf32>
    %84 = vector.broadcast %83 : vector<1x16xf32> to vector<4x16xf32>
    %85 = arith.addf %82, %84 : vector<4x16xf32>
    %86 = math.tanh %85 : vector<4x16xf32>
    %c0_48 = arith.constant 0 : index
    %c0_49 = arith.constant 0 : index
    %87 = vector.load %arg13[%c0_48, %c0_49] : memref<1x16xf32, #tpu.memory_space<vmem>>, vector<1x16xf32>
    %88 = vector.broadcast %87 : vector<1x16xf32> to vector<4x16xf32>
    %89 = arith.mulf %86, %88 : vector<4x16xf32>
    %cst_50 = arith.constant dense<0.000000e+00> : vector<4xf32>
    %90 = vector.multi_reduction <add>, %89, %cst_50 [1] : vector<4x16xf32> to vector<4xf32>
    %91 = vector.shape_cast %90 : vector<4xf32> to vector<4x1xf32>
    %c0_51 = arith.constant 0 : index
    %c0_52 = arith.constant 0 : index
    %92 = vector.load %arg14[%c0_51, %c0_52] : memref<1x1xf32, #tpu.memory_space<vmem>>, vector<1x1xf32>
    %93 = vector.broadcast %92 : vector<1x1xf32> to vector<4x1xf32>
    %94 = arith.addf %91, %93 : vector<4x1xf32>
    %95 = math.exp %94 : vector<4x1xf32>
    %96 = arith.addf %80, %95 : vector<4x1xf32>
    %cst_53 = arith.constant 9.99999993E-9 : f32
    %97 = vector.broadcast %cst_53 : f32 to vector<4x1xf32>
    %98 = arith.addf %96, %97 : vector<4x1xf32>
    %99 = tpu.reciprocal %98 {approx = true} : vector<4x1xf32> -> vector<4x1xf32>
    %100 = vector.broadcast %80 : vector<4x1xf32> to vector<4x40xf32>
    %101 = arith.mulf %64, %100 : vector<4x40xf32>
    %102 = vector.broadcast %95 : vector<4x1xf32> to vector<4x40xf32>
    %103 = arith.mulf %65, %102 : vector<4x40xf32>
    %104 = arith.addf %101, %103 : vector<4x40xf32>
    %105 = vector.broadcast %99 : vector<4x1xf32> to vector<4x40xf32>
    %106 = arith.mulf %104, %105 : vector<4x40xf32>
    %c0_54 = arith.constant 0 : index
    %c0_55 = arith.constant 0 : index
    %107 = vector.load %arg15[%c0_54, %c0_55] : memref<40x16xf32, #tpu.memory_space<vmem>>, vector<40x16xf32>
    %cst_56 = arith.constant dense<0.000000e+00> : vector<4x16xf32>
    %108 = tpu.matmul %106, %107, %cst_56 {dimension_numbers = #tpu.dot_dimension_numbers<[1], [0], [0], [1], [0, 0, 1, 1], [], []>} : vector<4x40xf32>, vector<40x16xf32>, vector<4x16xf32> -> vector<4x16xf32>
    %c0_57 = arith.constant 0 : index
    %c0_58 = arith.constant 0 : index
    %109 = vector.load %arg16[%c0_57, %c0_58] : memref<1x16xf32, #tpu.memory_space<vmem>>, vector<1x16xf32>
    %110 = vector.broadcast %109 : vector<1x16xf32> to vector<4x16xf32>
    %111 = arith.addf %108, %110 : vector<4x16xf32>
    %c0_59 = arith.constant 0 : index
    %c0_60 = arith.constant 0 : index
    %112 = vector.load %arg17[%c0_59, %c0_60] : memref<4x16xf32, #tpu.memory_space<vmem>>, vector<4x16xf32>
    tpu.vector_store %arg17[%c0_59, %c0_60], %111 {strides = array<i32>} : memref<4x16xf32, #tpu.memory_space<vmem>>, vector<4x16xf32>,
    return
  }
}

module attributes {stable_mosaic.version = 11 : i64} {
  func.func @user_score_kernel(%arg0: memref<2x5x16xf32, #tpu.memory_space<vmem>>, %arg1: memref<2x4x5xf32, #tpu.memory_space<vmem>>, %arg2: memref<2x4x3x16xf32, #tpu.memory_space<vmem>>, %arg3: memref<2x4x1xf32, #tpu.memory_space<vmem>>, %arg4: memref<16x16xf32, #tpu.memory_space<vmem>>, %arg5: memref<1x16xf32, #tpu.memory_space<vmem>>, %arg6: memref<1x16xf32, #tpu.memory_space<vmem>>, %arg7: memref<1x1xf32, #tpu.memory_space<vmem>>, %arg8: memref<1x1xf32, #tpu.memory_space<vmem>>) attributes {dimension_semantics = [], scalar_prefetch = 0 : i64, scratch_operands = 0 : i64, tpu.core_type = #tpu.core_type<tc>} {
    %c0 = arith.constant 0 : index
    %c0_0 = arith.constant 0 : index
    %0 = vector.load %arg4[%c0, %c0_0] : memref<16x16xf32, #tpu.memory_space<vmem>>, vector<16x16xf32>
    %c0_1 = arith.constant 0 : index
    %c0_2 = arith.constant 0 : index
    %1 = vector.load %arg5[%c0_1, %c0_2] : memref<1x16xf32, #tpu.memory_space<vmem>>, vector<1x16xf32>
    %c0_3 = arith.constant 0 : index
    %c0_4 = arith.constant 0 : index
    %2 = vector.load %arg6[%c0_3, %c0_4] : memref<1x16xf32, #tpu.memory_space<vmem>>, vector<1x16xf32>
    %c0_5 = arith.constant 0 : index
    %c0_6 = arith.constant 0 : index
    %3 = vector.load %arg7[%c0_5, %c0_6] : memref<1x1xf32, #tpu.memory_space<vmem>>, vector<1x1xf32>
    %4 = vector.extract %3[0, 0] : f32 from vector<1x1xf32>
    %cst = arith.constant 0.000000e+00 : f32
    %5 = vector.broadcast %cst : f32 to vector<1x1xf32>
    %cst_7 = arith.constant 0.000000e+00 : f32
    %6 = vector.broadcast %cst_7 : f32 to vector<1x1xf32>
    %c0_8 = arith.constant 0 : index
    %c0_9 = arith.constant 0 : index
    %c0_10 = arith.constant 0 : index
    %7 = vector.load %arg0[%c0_8, %c0_9, %c0_10] : memref<2x5x16xf32, #tpu.memory_space<vmem>>, vector<1x5x16xf32>
    %8 = vector.shape_cast %7 : vector<1x5x16xf32> to vector<5x16xf32>
    %c0_11 = arith.constant 0 : index
    %c0_12 = arith.constant 0 : index
    %c0_13 = arith.constant 0 : index
    %9 = vector.load %arg1[%c0_11, %c0_12, %c0_13] : memref<2x4x5xf32, #tpu.memory_space<vmem>>, vector<1x4x5xf32>
    %10 = vector.shape_cast %9 : vector<1x4x5xf32> to vector<4x5xf32>
    %cst_14 = arith.constant dense<0.000000e+00> : vector<5x16xf32>
    %11 = tpu.matmul %8, %0, %cst_14 {dimension_numbers = #tpu.dot_dimension_numbers<[1], [0], [0], [1], [0, 0, 1, 1], [], []>} : vector<5x16xf32>, vector<16x16xf32>, vector<5x16xf32> -> vector<5x16xf32>
    %12 = vector.broadcast %1 : vector<1x16xf32> to vector<5x16xf32>
    %13 = arith.addf %11, %12 : vector<5x16xf32>
    %14 = math.tanh %13 : vector<5x16xf32>
    %15 = vector.broadcast %2 : vector<1x16xf32> to vector<5x16xf32>
    %16 = arith.mulf %14, %15 : vector<5x16xf32>
    %cst_15 = arith.constant dense<0.000000e+00> : vector<5xf32>
    %17 = vector.multi_reduction <add>, %16, %cst_15 [1] : vector<5x16xf32> to vector<5xf32>
    %18 = vector.broadcast %4 : f32 to vector<5xf32>
    %19 = arith.addf %17, %18 : vector<5xf32>
    %20 = vector.shape_cast %19 : vector<5xf32> to vector<1x5xf32>
    %21 = vector.shape_cast %20 : vector<1x5xf32> to vector<1x5xf32>
    %22 = vector.broadcast %21 : vector<1x5xf32> to vector<4x5xf32>
    %cst_16 = arith.constant 0.000000e+00 : f32
    %23 = vector.broadcast %cst_16 : f32 to vector<4x5xf32>
    %24 = arith.cmpf oeq, %10, %23 : vector<4x5xf32>
    %cst_17 = arith.constant -1.000000e+08 : f32
    %25 = vector.broadcast %cst_17 : f32 to vector<4x5xf32>
    %26 = arith.select %24, %25, %22 : vector<4x5xi1>, vector<4x5xf32>
    %cst_18 = arith.constant dense<0xFF800000> : vector<4xf32>
    %27 = vector.multi_reduction <maximumf>, %26, %cst_18 [1] : vector<4x5xf32> to vector<4xf32>
    %28 = vector.shape_cast %27 : vector<4xf32> to vector<4x1xf32>
    %29 = vector.broadcast %28 : vector<4x1xf32> to vector<4x5xf32>
    %30 = arith.subf %26, %29 : vector<4x5xf32>
    %31 = math.exp %30 : vector<4x5xf32>
    %cst_19 = arith.constant dense<0.000000e+00> : vector<4xf32>
    %32 = vector.multi_reduction <add>, %31, %cst_19 [1] : vector<4x5xf32> to vector<4xf32>
    %33 = vector.shape_cast %32 : vector<4xf32> to vector<4x1xf32>
    %34 = tpu.reciprocal %33 {approx = true} : vector<4x1xf32> -> vector<4x1xf32>
    %35 = vector.broadcast %34 : vector<4x1xf32> to vector<4x5xf32>
    %36 = arith.mulf %31, %35 : vector<4x5xf32>
    %cst_20 = arith.constant dense<0.000000e+00> : vector<4x16xf32>
    %37 = tpu.matmul %36, %8, %cst_20 {dimension_numbers = #tpu.dot_dimension_numbers<[1], [0], [0], [1], [0, 0, 1, 1], [], []>} : vector<4x5xf32>, vector<5x16xf32>, vector<4x16xf32> -> vector<4x16xf32>
    %c0_21 = arith.constant 0 : index
    %c0_22 = arith.constant 0 : index
    %c0_23 = arith.constant 0 : index
    %c0_24 = arith.constant 0 : index
    %38 = vector.load %arg2[%c0_21, %c0_22, %c0_23, %c0_24] : memref<2x4x3x16xf32, #tpu.memory_space<vmem>>, vector<1x4x3x16xf32>
    %39 = vector.shape_cast %38 : vector<1x4x3x16xf32> to vector<4x3x16xf32>
    %40 = vector.extract_strided_slice %39 {offsets = [0, 0, 0], sizes = [4, 1, 16], strides = [1, 1, 1]} : vector<4x3x16xf32> to vector<4x1x16xf32>
    %41 = vector.shape_cast %40 : vector<4x1x16xf32> to vector<4x16xf32>
    %42 = arith.mulf %41, %37 : vector<4x16xf32>
    %cst_25 = arith.constant dense<0.000000e+00> : vector<4xf32>
    %43 = vector.multi_reduction <add>, %42, %cst_25 [1] : vector<4x16xf32> to vector<4xf32>
    %44 = vector.shape_cast %43 : vector<4xf32> to vector<4x1xf32>
    %45 = vector.extract_strided_slice %39 {offsets = [0, 1, 0], sizes = [4, 1, 16], strides = [1, 1, 1]} : vector<4x3x16xf32> to vector<4x1x16xf32>
    %46 = vector.shape_cast %45 : vector<4x1x16xf32> to vector<4x16xf32>
    %47 = arith.mulf %46, %37 : vector<4x16xf32>
    %cst_26 = arith.constant dense<0.000000e+00> : vector<4xf32>
    %48 = vector.multi_reduction <add>, %47, %cst_26 [1] : vector<4x16xf32> to vector<4xf32>
    %49 = vector.shape_cast %48 : vector<4xf32> to vector<4x1xf32>
    %50 = vector.extract_strided_slice %39 {offsets = [0, 2, 0], sizes = [4, 1, 16], strides = [1, 1, 1]} : vector<4x3x16xf32> to vector<4x1x16xf32>
    %51 = vector.shape_cast %50 : vector<4x1x16xf32> to vector<4x16xf32>
    %52 = arith.mulf %51, %37 : vector<4x16xf32>
    %cst_27 = arith.constant dense<0.000000e+00> : vector<4xf32>
    %53 = vector.multi_reduction <add>, %52, %cst_27 [1] : vector<4x16xf32> to vector<4xf32>
    %54 = vector.shape_cast %53 : vector<4xf32> to vector<4x1xf32>
    %55 = arith.maximumf %44, %49 : vector<4x1xf32>
    %56 = arith.maximumf %55, %54 : vector<4x1xf32>
    %57 = arith.subf %44, %56 : vector<4x1xf32>
    %58 = math.exp %57 : vector<4x1xf32>
    %59 = arith.subf %49, %56 : vector<4x1xf32>
    %60 = math.exp %59 : vector<4x1xf32>
    %61 = arith.subf %54, %56 : vector<4x1xf32>
    %62 = math.exp %61 : vector<4x1xf32>
    %63 = arith.addf %58, %60 : vector<4x1xf32>
    %64 = arith.addf %63, %62 : vector<4x1xf32>
    %65 = tpu.reciprocal %64 {approx = true} : vector<4x1xf32> -> vector<4x1xf32>
    %66 = arith.mulf %58, %65 : vector<4x1xf32>
    %cst_28 = arith.constant 9.99999971E-10 : f32
    %67 = vector.broadcast %cst_28 : f32 to vector<4x1xf32>
    %68 = arith.addf %66, %67 : vector<4x1xf32>
    %69 = math.log %68 : vector<4x1xf32>
    %cst_29 = arith.constant 0.000000e+00 : f32
    %70 = vector.broadcast %cst_29 : f32 to vector<4x1xf32>
    %71 = arith.subf %70, %69 : vector<4x1xf32>
    %c0_30 = arith.constant 0 : index
    %c0_31 = arith.constant 0 : index
    %c0_32 = arith.constant 0 : index
    %72 = vector.load %arg3[%c0_30, %c0_31, %c0_32] : memref<2x4x1xf32, #tpu.memory_space<vmem>>, vector<1x4x1xf32>
    %73 = vector.shape_cast %72 : vector<1x4x1xf32> to vector<4x1xf32>
    %74 = arith.mulf %71, %73 : vector<4x1xf32>
    %75 = vector.shape_cast %74 : vector<4x1xf32> to vector<1x4x1xf32>
    %cst_33 = arith.constant dense<0.000000e+00> : vector<1xf32>
    %76 = vector.multi_reduction <add>, %75, %cst_33 [1, 2] : vector<1x4x1xf32> to vector<1xf32>
    %77 = vector.shape_cast %76 : vector<1xf32> to vector<1x1x1xf32>
    %78 = vector.extract %77[0, 0, 0] : f32 from vector<1x1x1xf32>
    %79 = vector.broadcast %78 : f32 to vector<1x1xf32>
    %80 = arith.addf %5, %79 : vector<1x1xf32>
    %81 = vector.shape_cast %73 : vector<4x1xf32> to vector<1x4x1xf32>
    %cst_34 = arith.constant dense<0.000000e+00> : vector<1xf32>
    %82 = vector.multi_reduction <add>, %81, %cst_34 [1, 2] : vector<1x4x1xf32> to vector<1xf32>
    %83 = vector.shape_cast %82 : vector<1xf32> to vector<1x1x1xf32>
    %84 = vector.extract %83[0, 0, 0] : f32 from vector<1x1x1xf32>
    %85 = vector.broadcast %84 : f32 to vector<1x1xf32>
    %86 = arith.addf %6, %85 : vector<1x1xf32>
    %c1 = arith.constant 1 : index
    %c0_35 = arith.constant 0 : index
    %c0_36 = arith.constant 0 : index
    %87 = vector.load %arg0[%c1, %c0_35, %c0_36] : memref<2x5x16xf32, #tpu.memory_space<vmem>>, vector<1x5x16xf32>
    %88 = vector.shape_cast %87 : vector<1x5x16xf32> to vector<5x16xf32>
    %c1_37 = arith.constant 1 : index
    %c0_38 = arith.constant 0 : index
    %c0_39 = arith.constant 0 : index
    %89 = vector.load %arg1[%c1_37, %c0_38, %c0_39] : memref<2x4x5xf32, #tpu.memory_space<vmem>>, vector<1x4x5xf32>
    %90 = vector.shape_cast %89 : vector<1x4x5xf32> to vector<4x5xf32>
    %cst_40 = arith.constant dense<0.000000e+00> : vector<5x16xf32>
    %91 = tpu.matmul %88, %0, %cst_40 {dimension_numbers = #tpu.dot_dimension_numbers<[1], [0], [0], [1], [0, 0, 1, 1], [], []>} : vector<5x16xf32>, vector<16x16xf32>, vector<5x16xf32> -> vector<5x16xf32>
    %92 = vector.broadcast %1 : vector<1x16xf32> to vector<5x16xf32>
    %93 = arith.addf %91, %92 : vector<5x16xf32>
    %94 = math.tanh %93 : vector<5x16xf32>
    %95 = vector.broadcast %2 : vector<1x16xf32> to vector<5x16xf32>
    %96 = arith.mulf %94, %95 : vector<5x16xf32>
    %cst_41 = arith.constant dense<0.000000e+00> : vector<5xf32>
    %97 = vector.multi_reduction <add>, %96, %cst_41 [1] : vector<5x16xf32> to vector<5xf32>
    %98 = vector.broadcast %4 : f32 to vector<5xf32>
    %99 = arith.addf %97, %98 : vector<5xf32>
    %100 = vector.shape_cast %99 : vector<5xf32> to vector<1x5xf32>
    %101 = vector.shape_cast %100 : vector<1x5xf32> to vector<1x5xf32>
    %102 = vector.broadcast %101 : vector<1x5xf32> to vector<4x5xf32>
    %cst_42 = arith.constant 0.000000e+00 : f32
    %103 = vector.broadcast %cst_42 : f32 to vector<4x5xf32>
    %104 = arith.cmpf oeq, %90, %103 : vector<4x5xf32>
    %cst_43 = arith.constant -1.000000e+08 : f32
    %105 = vector.broadcast %cst_43 : f32 to vector<4x5xf32>
    %106 = arith.select %104, %105, %102 : vector<4x5xi1>, vector<4x5xf32>
    %cst_44 = arith.constant dense<0xFF800000> : vector<4xf32>
    %107 = vector.multi_reduction <maximumf>, %106, %cst_44 [1] : vector<4x5xf32> to vector<4xf32>
    %108 = vector.shape_cast %107 : vector<4xf32> to vector<4x1xf32>
    %109 = vector.broadcast %108 : vector<4x1xf32> to vector<4x5xf32>
    %110 = arith.subf %106, %109 : vector<4x5xf32>
    %111 = math.exp %110 : vector<4x5xf32>
    %cst_45 = arith.constant dense<0.000000e+00> : vector<4xf32>
    %112 = vector.multi_reduction <add>, %111, %cst_45 [1] : vector<4x5xf32> to vector<4xf32>
    %113 = vector.shape_cast %112 : vector<4xf32> to vector<4x1xf32>
    %114 = tpu.reciprocal %113 {approx = true} : vector<4x1xf32> -> vector<4x1xf32>
    %115 = vector.broadcast %114 : vector<4x1xf32> to vector<4x5xf32>
    %116 = arith.mulf %111, %115 : vector<4x5xf32>
    %cst_46 = arith.constant dense<0.000000e+00> : vector<4x16xf32>
    %117 = tpu.matmul %116, %88, %cst_46 {dimension_numbers = #tpu.dot_dimension_numbers<[1], [0], [0], [1], [0, 0, 1, 1], [], []>} : vector<4x5xf32>, vector<5x16xf32>, vector<4x16xf32> -> vector<4x16xf32>
    %c1_47 = arith.constant 1 : index
    %c0_48 = arith.constant 0 : index
    %c0_49 = arith.constant 0 : index
    %c0_50 = arith.constant 0 : index
    %118 = vector.load %arg2[%c1_47, %c0_48, %c0_49, %c0_50] : memref<2x4x3x16xf32, #tpu.memory_space<vmem>>, vector<1x4x3x16xf32>
    %119 = vector.shape_cast %118 : vector<1x4x3x16xf32> to vector<4x3x16xf32>
    %120 = vector.extract_strided_slice %119 {offsets = [0, 0, 0], sizes = [4, 1, 16], strides = [1, 1, 1]} : vector<4x3x16xf32> to vector<4x1x16xf32>
    %121 = vector.shape_cast %120 : vector<4x1x16xf32> to vector<4x16xf32>
    %122 = arith.mulf %121, %117 : vector<4x16xf32>
    %cst_51 = arith.constant dense<0.000000e+00> : vector<4xf32>
    %123 = vector.multi_reduction <add>, %122, %cst_51 [1] : vector<4x16xf32> to vector<4xf32>
    %124 = vector.shape_cast %123 : vector<4xf32> to vector<4x1xf32>
    %125 = vector.extract_strided_slice %119 {offsets = [0, 1, 0], sizes = [4, 1, 16], strides = [1, 1, 1]} : vector<4x3x16xf32> to vector<4x1x16xf32>
    %126 = vector.shape_cast %125 : vector<4x1x16xf32> to vector<4x16xf32>
    %127 = arith.mulf %126, %117 : vector<4x16xf32>
    %cst_52 = arith.constant dense<0.000000e+00> : vector<4xf32>
    %128 = vector.multi_reduction <add>, %127, %cst_52 [1] : vector<4x16xf32> to vector<4xf32>
    %129 = vector.shape_cast %128 : vector<4xf32> to vector<4x1xf32>
    %130 = vector.extract_strided_slice %119 {offsets = [0, 2, 0], sizes = [4, 1, 16], strides = [1, 1, 1]} : vector<4x3x16xf32> to vector<4x1x16xf32>
    %131 = vector.shape_cast %130 : vector<4x1x16xf32> to vector<4x16xf32>
    %132 = arith.mulf %131, %117 : vector<4x16xf32>
    %cst_53 = arith.constant dense<0.000000e+00> : vector<4xf32>
    %133 = vector.multi_reduction <add>, %132, %cst_53 [1] : vector<4x16xf32> to vector<4xf32>
    %134 = vector.shape_cast %133 : vector<4xf32> to vector<4x1xf32>
    %135 = arith.maximumf %124, %129 : vector<4x1xf32>
    %136 = arith.maximumf %135, %134 : vector<4x1xf32>
    %137 = arith.subf %124, %136 : vector<4x1xf32>
    %138 = math.exp %137 : vector<4x1xf32>
    %139 = arith.subf %129, %136 : vector<4x1xf32>
    %140 = math.exp %139 : vector<4x1xf32>
    %141 = arith.subf %134, %136 : vector<4x1xf32>
    %142 = math.exp %141 : vector<4x1xf32>
    %143 = arith.addf %138, %140 : vector<4x1xf32>
    %144 = arith.addf %143, %142 : vector<4x1xf32>
    %145 = tpu.reciprocal %144 {approx = true} : vector<4x1xf32> -> vector<4x1xf32>
    %146 = arith.mulf %138, %145 : vector<4x1xf32>
    %cst_54 = arith.constant 9.99999971E-10 : f32
    %147 = vector.broadcast %cst_54 : f32 to vector<4x1xf32>
    %148 = arith.addf %146, %147 : vector<4x1xf32>
    %149 = math.log %148 : vector<4x1xf32>
    %cst_55 = arith.constant 0.000000e+00 : f32
    %150 = vector.broadcast %cst_55 : f32 to vector<4x1xf32>
    %151 = arith.subf %150, %149 : vector<4x1xf32>
    %c1_56 = arith.constant 1 : index
    %c0_57 = arith.constant 0 : index
    %c0_58 = arith.constant 0 : index
    %152 = vector.load %arg3[%c1_56, %c0_57, %c0_58] : memref<2x4x1xf32, #tpu.memory_space<vmem>>, vector<1x4x1xf32>
    %153 = vector.shape_cast %152 : vector<1x4x1xf32> to vector<4x1xf32>
    %154 = arith.mulf %151, %153 : vector<4x1xf32>
    %155 = vector.shape_cast %154 : vector<4x1xf32> to vector<1x4x1xf32>
    %cst_59 = arith.constant dense<0.000000e+00> : vector<1xf32>
    %156 = vector.multi_reduction <add>, %155, %cst_59 [1, 2] : vector<1x4x1xf32> to vector<1xf32>
    %157 = vector.shape_cast %156 : vector<1xf32> to vector<1x1x1xf32>
    %158 = vector.extract %157[0, 0, 0] : f32 from vector<1x1x1xf32>
    %159 = vector.broadcast %158 : f32 to vector<1x1xf32>
    %160 = arith.addf %80, %159 : vector<1x1xf32>
    %161 = vector.shape_cast %153 : vector<4x1xf32> to vector<1x4x1xf32>
    %cst_60 = arith.constant dense<0.000000e+00> : vector<1xf32>
    %162 = vector.multi_reduction <add>, %161, %cst_60 [1, 2] : vector<1x4x1xf32> to vector<1xf32>
    %163 = vector.shape_cast %162 : vector<1xf32> to vector<1x1x1xf32>
    %164 = vector.extract %163[0, 0, 0] : f32 from vector<1x1x1xf32>
    %165 = vector.broadcast %164 : f32 to vector<1x1xf32>
    %166 = arith.addf %86, %165 : vector<1x1xf32>
    %cst_61 = arith.constant 9.99999971E-10 : f32
    %167 = vector.broadcast %cst_61 : f32 to vector<1x1xf32>
    %168 = arith.addf %166, %167 : vector<1x1xf32>
    %169 = arith.divf %160, %168 : vector<1x1xf32>
    %c0_62 = arith.constant 0 : index
    %c0_63 = arith.constant 0 : index
    %170 = vector.load %arg8[%c0_62, %c0_63] : memref<1x1xf32, #tpu.memory_space<vmem>>, vector<1x1xf32>
    tpu.vector_store %arg8[%c0_62, %c0_63], %169 {strides = array<i32>} : memref<1x1xf32, #tpu.memory_space<vmem>>, vector<1x1xf32>,
    return
  }
}

</mosaic_0001>

<bundles_post_ra>
// kernel: mul.12
= control target key start
LH: loop header
LB: loop body
LE: loop exit
PB: predicated region body
PF: predicated region fallthrough
CT: control target
= control target key end

     0   :  { %s37_s8 = smov 8   ;;  %s38_s9 = smov 16   ;;  %vm7_vm0 = vcmask 64512   ;;  %vm13_vm1 = vcmask 261312   ;;  %vm19_vm2 = vcmask 195712   ;;  %vm25_vm3 = vcmask 130112   ;;  %s55_s0 = inlined_call_operand.vmem [shape: f32[4,8], index: 0, kind: input, shape index: {}]   ;;  %s56_s1 = inlined_call_operand.vmem [shape: f32[32], index: 1, kind: output, shape index: {}]  }
   0x1   :  { %v4_v0 = vld [vmem:[%s55_s0] sm:$0xf]  ;;  %s36_s0 = smov 24  }
   0x2   :  { %5 = vst [vmem:[#allocation1] sm:$0xf] %v4_v0 }
   0x9   :  { %v10_v1 = vld [vmem:[#allocation1 + $0x3] sm:$0x1]   ;;  %v22_v2 = vld [vmem:[#allocation1 + $0x1] sm:$0x1]   ;;  %v16_v3 = vld [vmem:[#allocation1 + $0x2] sm:$0x1]  }
   0xa   :  { %11 = vrot.lane.b32.xlu0 %v10_v1, %s36_s0  ;;  %23 = vrot.lane.b32.xlu1 %v22_v2, %s37_s8  ;;  %v6_v4 = vld [vmem:[#allocation1] sm:$0x1]  }
   0xb   :  { %8 = vst.msk [vmem:[#allocation0] sm:$0x1] %vm7_vm0, %v6_v4  }
  0x12   :  { %17 = vrot.lane.b32.xlu0 %v16_v3, %s38_s9 }
  0x7c   :  { %v12_v5 = vpop.permute.xlu0 %11   ;;  %v24_v6 = vpop.permute.xlu1 %23  }
  0x7d   :  { %14 = vst.msk [vmem:[#allocation0] sm:$0x1] %vm13_vm1, %v12_v5  }
  0x84   :  { %v18_v7 = vpop.permute.xlu0 %17  }
  0x85   :  { %20 = vst.msk [vmem:[#allocation0] sm:$0x1] %vm19_vm2, %v18_v7  }
  0x86   :  { %26 = vst.msk [vmem:[#allocation0] sm:$0x1] %vm25_vm3, %v24_v6  }
  0x8d   :  { %v29_v8 = vld [vmem:[#allocation0] sm:$0x1] }
  0x8e   :  { %32 = vst [vmem:[%s56_s1] sm:$0x1] %v29_v8 }

// kernel: model_bert_forward.2
= control target key start
LH: loop header
LB: loop body
LE: loop exit
PB: predicated region body
PF: predicated region fallthrough
CT: control target
= control target key end

     0   :  { %vm76_vm0 = vcmask 261120   ;;  %s894_s29 = smov 108   ;;  %s897_s30 = smov 28   ;;  %vm130_vm1 = vcmask 162816   ;;  %vm444_vm2 = vcmask 326656   ;;  %vm498_vm3 = vcmask 130048   ;;  %s1217_s4 = inlined_call_operand.vmem [shape: f32[32,120], index: 4, kind: input, shape index: {}]   ;;  %s1218_s5 = inlined_call_operand.vmem [shape: f32[1,120], index: 5, kind: input, shape index: {}]   ;;  %s1219_s0 = inlined_call_operand.vmem [shape: f32[32,32], index: 0, kind: input, shape index: {}]   ;;  %s1220_s1 = inlined_call_operand.vmem [shape: f32[32,32], index: 1, kind: input, shape index: {}]   ;;  %s1221_s7 = inlined_call_operand.vmem [shape: f32[1,16], index: 7, kind: input, shape index: {}]   ;;  %s1222_s6 = inlined_call_operand.vmem [shape: f32[40,16], index: 6, kind: input, shape index: {}]   ;;  %s1223_s8 = inlined_call_operand.vmem [shape: f32[1,16], index: 8, kind: input, shape index: {}]   ;;  %s1224_s9 = inlined_call_operand.<no memory space> [shape: f32[1,1], index: 9, kind: input, shape index: {}]   ;;  %s1225_s2 = inlined_call_operand.vmem [shape: f32[32,1], index: 2, kind: input, shape index: {}]   ;;  %s1226_s3 = inlined_call_operand.vmem [shape: f32[4,32], index: 3, kind: input, shape index: {}]   ;;  %s1227_s11 = inlined_call_operand.vmem [shape: f32[40,16], index: 11, kind: input, shape index: {}]   ;;  %s1228_s12 = inlined_call_operand.vmem [shape: f32[1,16], index: 12, kind: input, shape index: {}]   ;;  %s1229_s10 = inlined_call_operand.vmem [shape: f32[4,40], index: 10, kind: input, shape index: {}]   ;;  %s1230_s13 = inlined_call_operand.vmem [shape: f32[1,16], index: 13, kind: input, shape index: {}]   ;;  %s1231_s14 = inlined_call_operand.<no memory space> [shape: f32[1,1], index: 14, kind: input, shape index: {}]   ;;  %s1232_s16 = inlined_call_operand.vmem [shape: f32[1,16], index: 16, kind: input, shape index: {}]   ;;  %s1233_s15 = inlined_call_operand.vmem [shape: f32[40,16], index: 15, kind: input, shape index: {}]   ;;  %s1234_s17 = inlined_call_operand.vmem [shape: f32[4,16], index: 17, kind: output, shape index: {}]  }
   0x1   :  { %1236 = sst [smem:[#allocation4_spill]] %s1217_s4  ;;  %v60_v4 = vld [vmem:[%s1219_s0] sm:$0xff]  ;;  %v61_v5 = vld [vmem:[%s1219_s0 + $0x8] sm:$0xff]  ;;  %v62_v6 = vld [vmem:[%s1219_s0 + $0x10] sm:$0xff]  ;;  %s895_s4 = smov 68   ;;  %vm646_vm4 = vcmask 125952  }
   0x2   :  { %1237 = sst [smem:[#allocation5_spill]] %s1218_s5  ;;  %v63_v7 = vld [vmem:[%s1219_s0 + $0x18] sm:$0xff]  ;;  %s896_s0 = smov 88   ;;  %v64_v39 = vld [vmem:[%s1220_s1] sm:$0xff]  ;;  %v65_v47 = vld [vmem:[%s1220_s1 + $0x8] sm:$0xff] }
   0x3   :  { %s1238_s26 = sld [smem:[#allocation4_spill]]  ;;  %v66_v58 = vld [vmem:[%s1220_s1 + $0x10] sm:$0xff]  ;;  %s899_s25 = smov 20  }
   0x4   :  { %s1239_s28 = sld [smem:[#allocation5_spill]]  ;;  %s901_s27 = smov 40  }
   0x9   :  { %v71_v0 = vld [vmem:[%s1238_s26 + $0x18] sm:$0xff]  ;;  %v70_v1 = vld [vmem:[%s1238_s26 + $0x10] sm:$0xff]  ;;  %v69_v2 = vld [vmem:[%s1238_s26 + $0x8] sm:$0xff] }
   0xa   :  { %101 = vmatpush.msra.mxu0 %v71_v0  ;;  %v68_v3 = vld [vmem:[%s1238_s26] sm:$0xff] }
   0xb   :  { %v826_v8 = vld [vmem:[%s1239_s28] ss:$0 sm:$0xff] }
   0xc   :  { %102 = vmatpush.msra.mxu0 %v70_v1 }
   0xe   :  { %103 = vmatpush.msra.mxu0 %v69_v2 }
  0x10   :  { %104 = vmatpush.msra.mxu0 %v68_v3 }
  0x11   :  { %747 = vmatmul.msk.f32.vlgmr.msra.gmra.mxu0 %vm76_vm0, %v60_v4 }
  0x19   :  { %748 = vmatmul.msk.f32.gmra.mxu0 %vm76_vm0, %v61_v5  ;;  %v67_v5 = vld [vmem:[%s1220_s1 + $0x18] sm:$0xff]  ;;  %s898_s1 = smov 48  }
  0x21   :  { %749 = vmatmul.msk.f32.gmra.mxu0 %vm76_vm0, %v62_v6 }
  0x29   :  { %750 = vmatmul.msk.f32.gmra.mxu0 %vm76_vm0, %v63_v7 }
  0x8e   :  { %v106_v9 = vpop.f32.mrf.mxu0 }
  0x8f   :  { %v107_v10 = vadd.f32 %v826_v8, %v106_v9 }
  0x91   :  { %265 = vrot.lane.b32.xlu2 %v107_v10, %s894_s29 }
  0x96   :  { %v109_v11 = vpop.f32.mrf.mxu0 }
  0x97   :  { %v110_v12 = vadd.f32 %v826_v8, %v109_v11 }
  0x99   :  { %275 = vrot.lane.b32.xlu1 %v110_v12, %s895_s4  ;;  %267 = vrot.lane.b32.xlu2 %v110_v12, %s894_s29  ;;  %v1024_v17 = vpack.i.bf16 %v107_v10, %v110_v12 }
  0x9e   :  { %v112_v13 = vpop.f32.mrf.mxu0 }
  0x9f   :  { %v113_v16 = vadd.f32 %v826_v8, %v112_v13 }
  0xa1   :  { %273 = vrot.lane.b32.xlu1 %v107_v10, %s895_s4 }
  0xa6   :  { %v115_v14 = vpop.f32.mrf.mxu0 }
  0xa7   :  { %v116_v15 = vadd.f32 %v826_v8, %v115_v14 }
  0xa9   :  { %279 = vrot.lane.b32.xlu0 %v116_v15, %s895_s4  ;;  %271 = vrot.lane.b32.xlu2 %v116_v15, %s894_s29  ;;  %v1027_v18 = vpack.i.bf16 %v113_v16, %v116_v15 }
  0xaa   :  { %128 = vrot.lane.b32.xlu1 %v116_v15, %s896_s0 }
  0xb1   :  { %277 = vrot.lane.b32.xlu0 %v113_v16, %s895_s4  ;;  %122 = vrot.lane.b32.xlu2 %v107_v10, %s896_s0 }
  0xb2   :  { %124 = vrot.lane.b32.xlu1 %v110_v12, %s896_s0 }
  0xb9   :  { %269 = vrot.lane.b32.xlu0 %v113_v16, %s894_s29 }
  0xba   :  { %793 = vrot.lane.b32.xlu1 %v1024_v17, %s897_s30 }
  0xc1   :  { %126 = vrot.lane.b32.xlu0 %v113_v16, %s896_s0 }
  0xc2   :  { %798 = vrot.lane.b32.xlu1 %v1027_v18, %s897_s30 }
  0xeb   :  { %v266_v23 = vpop.permute.xlu2 %265 }
  0xf3   :  { %v268_v26 = vpop.permute.xlu2 %267 }
 0x103   :  { %v272_v29 = vpop.permute.xlu2 %271 }
 0x10b   :  { %v276_v19 = vpop.permute.xlu1 %275  ;;  %v123_v35 = vpop.permute.xlu2 %122 }
 0x113   :  { %v274_v20 = vpop.permute.xlu1 %273 }
 0x11b   :  { %v280_v21 = vpop.permute.xlu0 %279 }
 0x11c   :  { %v129_v22 = vpop.permute.xlu1 %128  ;;  %763 = vmatpush.xpose.msk.msra.mxu3 %vm130_vm1, %v280_v21 }
 0x11d   :  { %751 = vmatpush.xpose.msk.msra.mxu1 %vm130_vm1, %v129_v22 }
 0x123   :  { %v278_v24 = vpop.permute.xlu0 %277 }
 0x124   :  { %v125_v25 = vpop.permute.xlu1 %124  ;;  %764 = vmatpush.xpose.msk.msra.mxu3 %vm130_vm1, %v278_v24 }
 0x128   :  { %765 = vmatpush.xpose.msk.msra.mxu3 %vm130_vm1, %v276_v19 }
 0x12b   :  { %v270_v27 = vpop.permute.xlu0 %269 }
 0x12c   :  { %v794_v28 = vpop.permute.xlu1 %793  ;;  %766 = vmatpush.xpose.msk.msra.mxu3 %vm130_vm1, %v274_v20 }
 0x12d   :  { %v795_v34 = vunpack.i.l.bf16 %v794_v28  ;;  %v796_v36 = vunpack.i.h.bf16 %v794_v28 }
 0x12f   :  { %767 = vmatmul.msk.f32.vlgmr.msra.gmra.mxu3 %vm130_vm1, %v266_v23 }
 0x133   :  { %v127_v30 = vpop.permute.xlu0 %126 }
 0x134   :  { %v799_v31 = vpop.permute.xlu1 %798  ;;  %752 = vmatpush.xpose.msk.msra.mxu1 %vm130_vm1, %v127_v30 }
 0x135   :  { %v800_v32 = vunpack.i.l.bf16 %v799_v31  ;;  %v801_v33 = vunpack.i.h.bf16 %v799_v31 }
 0x137   :  { %398 = vmatpush.msrb.mxu0 %v800_v32  ;;  %768 = vmatmul.msk.f32.gmra.mxu3 %vm130_vm1, %v268_v26 }
 0x138   :  { %753 = vmatpush.xpose.msk.msra.mxu1 %vm130_vm1, %v125_v25 }
 0x139   :  { %399 = vmatpush.msrb.mxu0 %v801_v33 }
 0x13b   :  { %400 = vmatpush.msrb.mxu0 %v795_v34 }
 0x13c   :  { %754 = vmatpush.xpose.msk.msra.mxu1 %vm130_vm1, %v123_v35 }
 0x13d   :  { %401 = vmatpush.msrb.mxu0 %v796_v36 }
 0x13f   :  { %755 = vmatmul.msk.f32.vlgmr.msra.gmra.mxu1 %vm130_vm1, %v107_v10  ;;  %769 = vmatmul.msk.f32.gmra.mxu3 %vm130_vm1, %v270_v27 }
 0x147   :  { %756 = vmatmul.msk.f32.gmra.mxu1 %vm130_vm1, %v110_v12  ;;  %770 = vmatmul.msk.f32.gmra.mxu3 %vm130_vm1, %v272_v29 }
 0x14f   :  { %757 = vmatmul.msk.f32.gmra.mxu1 %vm130_vm1, %v113_v16 }
 0x157   :  { %758 = vmatmul.msk.f32.gmra.mxu1 %vm130_vm1, %v116_v15 }
 0x1b2   :  { %v314_v37 = vpop.f32.mrf.mxu3 }
 0x1b3   :  { %v326_v38 = vmul.f32 1.442695, %v314_v37 }
 0x1b5   :  { %834 = vpow2.f32 %v326_v38 }
 0x1ba   :  { %v317_v40 = vpop.f32.mrf.mxu3 }
 0x1bb   :  { %v835_v41 = vpop.eup %834  ;;  %v328_v42 = vmul.f32 1.442695, %v317_v40 }
 0x1bc   :  { %v164_v43 = vpop.f32.mrf.mxu1  ;;  %v334_v44 = vmul.f32 %v835_v41, %v64_v39 }
 0x1bd   :  { %836 = vpow2.f32 %v328_v42  ;;  %v176_v45 = vmul.f32 1.442695, %v164_v43 }
 0x1be   :  { %v338_v46 = vsel %vm76_vm0, %v334_v44, 0.0 }
 0x1bf   :  { %838 = vpow2.f32 %v176_v45  ;;  %339 = vadd.xlane.f32.xlu0 %v338_v46 }
 0x1c2   :  { %v320_v48 = vpop.f32.mrf.mxu3 }
 0x1c3   :  { %v837_v49 = vpop.eup %836  ;;  %v330_v50 = vmul.f32 1.442695, %v320_v48 }
 0x1c4   :  { %v167_v51 = vpop.f32.mrf.mxu1  ;;  %v335_v52 = vmul.f32 %v837_v49, %v65_v47 }
 0x1c5   :  { %v839_v53 = vpop.eup %838  ;;  %840 = vpow2.f32 %v330_v50  ;;  %v178_v54 = vmul.f32 1.442695, %v167_v51 }
 0x1c6   :  { %v341_v55 = vsel %vm76_vm0, %v335_v52, 0.0  ;;  %v1054_v56 = vmul.f32 %v839_v53, %v64_v39 }
 0x1c7   :  { %842 = vpow2.f32 %v178_v54  ;;  %342 = vadd.xlane.f32.xlu2 %v341_v55 }
 0x1c8   :  { %v188_v57 = vsel %vm76_vm0, %v1054_v56, 0.0 }
 0x1c9   :  { %189 = vadd.xlane.f32.xlu0 %v188_v57 }
 0x1ca   :  { %v323_v59 = vpop.f32.mrf.mxu3 }
 0x1cb   :  { %v841_v60 = vpop.eup %840  ;;  %v332_v61 = vmul.f32 1.442695, %v323_v59  ;;  %v439_v59 = vld [vmem:[%s1222_s6 + $0x20] sm:$0xff] }
 0x1cc   :  { %v170_v62 = vpop.f32.mrf.mxu1  ;;  %v336_v63 = vmul.f32 %v841_v60, %v66_v58  ;;  %v438_v60 = vld [vmem:[%s1222_s6 + $0x18] sm:$0xff] }
 0x1cd   :  { %v843_v0 = vpop.eup %842  ;;  %844 = vpow2.f32 %v332_v61  ;;  %v180_v1 = vmul.f32 1.442695, %v170_v62  ;;  %v437_v61 = vld [vmem:[%s1222_s6 + $0x10] sm:$0xff]  ;;  %v436_v62 = vld [vmem:[%s1222_s6 + $0x8] sm:$0xff] }
 0x1ce   :  { %v344_v2 = vsel %vm76_vm0, %v336_v63, 0.0  ;;  %v1062_v3 = vmul.f32 %v843_v0, %v65_v47 }
 0x1cf   :  { %846 = vpow2.f32 %v180_v1  ;;  %345 = vadd.xlane.f32.xlu1 %v344_v2 }
 0x1d0   :  { %v191_v4 = vsel %vm76_vm0, %v1062_v3, 0.0 }
 0x1d1   :  { %192 = vadd.xlane.f32.xlu0 %v191_v4 }
 0x1d3   :  { %v845_v6 = vpop.eup %844 }
 0x1d4   :  { %v173_v7 = vpop.f32.mrf.mxu1  ;;  %v337_v8 = vmul.f32 %v845_v6, %v67_v5 }
 0x1d5   :  { %v847_v9 = vpop.eup %846  ;;  %v182_v10 = vmul.f32 1.442695, %v173_v7 }
 0x1d6   :  { %v347_v11 = vsel %vm76_vm0, %v337_v8, 0.0  ;;  %v1070_v12 = vmul.f32 %v847_v9, %v66_v58 }
 0x1d7   :  { %848 = vpow2.f32 %v182_v10  ;;  %348 = vadd.xlane.f32.xlu2 %v347_v11 }
 0x1d8   :  { %v194_v13 = vsel %vm76_vm0, %v1070_v12, 0.0 }
 0x1d9   :  { %195 = vadd.xlane.f32.xlu1 %v194_v13  ;;  %v827_v13 = vld [vmem:[%s1221_s7] ss:$0 sm:$0xff] }
 0x1dd   :  { %v849_v14 = vpop.eup %848 }
 0x1de   :  { %v187_v15 = vmul.f32 %v849_v14, %v67_v5 }
 0x1e0   :  { %v197_v16 = vsel %vm76_vm0, %v187_v15, 0.0 }
 0x1e1   :  { %198 = vadd.xlane.f32.xlu1 %v197_v16  ;;  %v22_v16 = vstv %s1224_s9 }
 0x1e2   :  { %23 = vst [vmem:[#allocation2] sm:$0x1] %v22_v16 }
 0x1e5   :  { %808 = vrot.lane.b32.xlu0 %v1024_v17, %s898_s1 }
 0x1ef   :  { %803 = vrot.lane.b32.xlu2 %v1027_v18, %s898_s1 }
 0x232   :  { %v340_v19 = vpop.xlane.xlu0 %339 }
 0x233   :  { %v350_v20 = vadd.f32 1e-08, %v340_v19 }
 0x235   :  { %850 = vrcp.f32 %v350_v20  ;;  %v828_v20 = vld [vmem:[%s1223_s8] ss:$0 sm:$0xff] }
 0x23a   :  { %v343_v21 = vpop.xlane.xlu2 %342 }
 0x23b   :  { %v851_v22 = vpop.eup %850  ;;  %v351_v23 = vadd.f32 1e-08, %v343_v21 }
 0x23c   :  { %v358_v24 = vmul.f32 %v851_v22, %v334_v44  ;;  %v190_v29 = vpop.xlane.xlu0 %189 }
 0x23d   :  { %852 = vrcp.f32 %v351_v23  ;;  %v200_v32 = vadd.f32 1e-08, %v190_v29 }
 0x23e   :  { %771 = vmatmul.msk.f32.vlgmr.msrb.gmra.mxu0 %vm76_vm0, %v358_v24 }
 0x242   :  { %v346_v25 = vpop.xlane.xlu1 %345 }
 0x243   :  { %v853_v26 = vpop.eup %852  ;;  %v352_v27 = vadd.f32 1e-08, %v346_v25 }
 0x244   :  { %v359_v28 = vmul.f32 %v853_v26, %v335_v52  ;;  %v193_v33 = vpop.xlane.xlu0 %192 }
 0x245   :  { %854 = vrcp.f32 %v352_v27  ;;  %v201_v39 = vadd.f32 1e-08, %v193_v33 }
 0x246   :  { %772 = vmatmul.msk.f32.gmra.mxu0 %vm76_vm0, %v359_v28 }
 0x24a   :  { %v349_v17 = vpop.xlane.xlu2 %348 }
 0x24b   :  { %v855_v18 = vpop.eup %854  ;;  %v353_v30 = vadd.f32 1e-08, %v349_v17 }
 0x24c   :  { %v360_v31 = vmul.f32 %v855_v18, %v336_v63  ;;  %v196_v43 = vpop.xlane.xlu1 %195  ;;  %v435_v63 = vld [vmem:[%s1222_s6] sm:$0xff] }
 0x24d   :  { %856 = vrcp.f32 %v353_v30  ;;  %v202_v46 = vadd.f32 1e-08, %v196_v43 }
 0x24e   :  { %773 = vmatmul.msk.f32.gmra.mxu0 %vm76_vm0, %v360_v31  ;;  %858 = vrcp.f32 %v200_v32 }
 0x24f   :  { %860 = vrcp.f32 %v201_v39 }
 0x250   :  { %862 = vrcp.f32 %v202_v46 }
 0x252   :  { %v804_v34 = vpop.permute.xlu2 %803 }
 0x253   :  { %v857_v35 = vpop.eup %856  ;;  %v805_v36 = vunpack.i.l.bf16 %v804_v34  ;;  %v806_v38 = vunpack.i.h.bf16 %v804_v34 }
 0x254   :  { %v361_v37 = vmul.f32 %v857_v35, %v337_v8  ;;  %v859_v41 = vpop.eup %858  ;;  %v199_v48 = vpop.xlane.xlu1 %198  ;;  %v900_v35 = vmov 0  }
 0x255   :  { %248 = vmatpush.msra.mxu2 %v805_v36  ;;  %v208_v45 = vmul.f32 %v859_v41, %v1054_v56  ;;  %v861_v47 = vpop.eup %860  ;;  %v203_v50 = vadd.f32 1e-08, %v199_v48  ;;  %813 = vset.pattern.permute.xlu2 %v900_v35  ;;  %v829_v36 = vld [vmem:[#allocation2] ss:$0 sm:$0xff]  ;;  %v529_v48 = vld [vmem:[%s1225_s2 + $0x10] sm:$0xff] }
 0x256   :  { %774 = vmatmul.msk.f32.gmra.mxu0 %vm76_vm0, %v361_v37  ;;  %v209_v49 = vmul.f32 %v861_v47, %v1062_v3  ;;  %v863_v51 = vpop.eup %862  ;;  %812 = vset.pattern.permute.xlu0 %v900_v35 }
 0x257   :  { %249 = vmatpush.msra.mxu2 %v806_v38  ;;  %v809_v40 = vpop.permute.xlu0 %808  ;;  %864 = vrcp.f32 %v203_v50  ;;  %v210_v52 = vmul.f32 %v863_v51, %v1070_v12 }
 0x258   :  { %v810_v42 = vunpack.i.l.bf16 %v809_v40  ;;  %v811_v44 = vunpack.i.h.bf16 %v809_v40 }
 0x25a   :  { %250 = vmatpush.msra.mxu2 %v810_v42  ;;  %v528_v42 = vld [vmem:[%s1225_s2 + $0x8] sm:$0xff] }
 0x25c   :  { %251 = vmatpush.msra.mxu2 %v811_v44 }
 0x25d   :  { %759 = vmatmul.msk.f32.vlgmr.msra.gmra.mxu2 %vm76_vm0, %v208_v45  ;;  %v865_v53 = vpop.eup %864 }
 0x25e   :  { %v211_v54 = vmul.f32 %v865_v53, %v187_v15  ;;  %468 = vmatpush.msrb.mxu2 %v439_v59  ;;  %v527_v59 = vld [vmem:[%s1225_s2] sm:$0xff] }
 0x260   :  { %469 = vmatpush.msrb.mxu2 %v438_v60 }
 0x262   :  { %470 = vmatpush.msrb.mxu2 %v437_v61 }
 0x264   :  { %471 = vmatpush.msrb.mxu2 %v436_v62 }
 0x265   :  { %760 = vmatmul.msk.f32.gmra.mxu2 %vm76_vm0, %v209_v49 }
 0x266   :  { %472 = vmatpush.msrb.mxu2 %v435_v63 }
 0x26d   :  { %761 = vmatmul.msk.f32.gmra.mxu2 %vm76_vm0, %v210_v52 }
 0x275   :  { %762 = vmatmul.msk.f32.gmra.mxu2 %vm76_vm0, %v211_v54  ;;  %v530_v54 = vld [vmem:[%s1225_s2 + $0x18] sm:$0xff] }
 0x2bb   :  { %v403_v55 = vpop.f32.mrf.mxu0 }
 0x2bc   :  { %419 = vrot.lane.b32.xlu2 %v403_v55, %s899_s25 }
 0x2c3   :  { %v406_v56 = vpop.f32.mrf.mxu0 }
 0x2c4   :  { %421 = vrot.lane.b32.xlu1 %v406_v56, %s899_s25 }
 0x2cb   :  { %v409_v57 = vpop.f32.mrf.mxu0 }
 0x2cc   :  { %423 = vrot.lane.b32.xlu0 %v409_v57, %s899_s25 }
 0x2d3   :  { %v412_v58 = vpop.f32.mrf.mxu0 }
 0x2d4   :  { %425 = vrot.lane.b32.xlu2 %v412_v58, %s899_s25 }
 0x2e0   :  { %v253_v0 = vpop.f32.mrf.mxu2 }
 0x2e8   :  { %v256_v3 = vpop.f32.mrf.mxu2 }
 0x2f0   :  { %v259_v6 = vpop.f32.mrf.mxu2 }
 0x2f8   :  { %v262_v10 = vpop.f32.mrf.mxu2 }
 0x316   :  { %v420_v1 = vpop.permute.xlu2 %419 }
 0x317   :  { %v1104_v2 = vsel %vm130_vm1, %v253_v0, %v420_v1 }
 0x318   :  { %775 = vmatmul.msk.f32.vlgmr.msrb.gmra.mxu2 %vm444_vm2, %v1104_v2 }
 0x32e   :  { %v426_v9 = vpop.permute.xlu2 %425 }
 0x32f   :  { %v1119_v11 = vsel %vm130_vm1, %v262_v10, %v426_v9 }
 0x336   :  { %v422_v4 = vpop.permute.xlu1 %421 }
 0x337   :  { %v1109_v5 = vsel %vm130_vm1, %v256_v3, %v422_v4 }
 0x338   :  { %776 = vmatmul.msk.f32.gmra.mxu2 %vm444_vm2, %v1109_v5 }
 0x33e   :  { %v424_v7 = vpop.permute.xlu0 %423 }
 0x33f   :  { %v1114_v8 = vsel %vm130_vm1, %v259_v6, %v424_v7 }
 0x340   :  { %777 = vmatmul.msk.f32.gmra.mxu2 %vm444_vm2, %v1114_v8 }
 0x348   :  { %778 = vmatmul.msk.f32.gmra.mxu2 %vm444_vm2, %v1119_v11 }
 0x39b   :  { %v474_v12 = vpop.f32.mrf.mxu2 }
 0x39c   :  { %v475_v29 = vadd.f32 %v827_v13, %v474_v12 }
 0x3bb   :  { %v477_v14 = vpop.f32.mrf.mxu2 }
 0x3bc   :  { %v478_v15 = vadd.f32 %v827_v13, %v477_v14 }
 0x3be   :  { %866 = vtanh.f32 %v478_v15 }
 0x3c3   :  { %v480_v19 = vpop.f32.mrf.mxu2 }
 0x3c4   :  { %v867_v21 = vpop.eup %866  ;;  %v481_v22 = vadd.f32 %v827_v13, %v480_v19 }
 0x3c5   :  { %v495_v23 = vmul.f32 %v867_v21, %v828_v20 }
 0x3c6   :  { %868 = vtanh.f32 %v481_v22  ;;  %v902_v22 = vmov 40  }
 0x3c7   :  { %v502_v24 = vsel %vm498_vm3, %v495_v23, 0.0  ;;  %v610_v23 = vld [vmem:[%s1227_s11 + $0x10] sm:$0xff] }
 0x3c8   :  { %503 = vadd.xlane.f32.xlu1 %v502_v24  ;;  %v609_v24 = vld [vmem:[%s1227_s11 + $0x8] sm:$0xff] }
 0x3cb   :  { %v483_v25 = vpop.f32.mrf.mxu2 }
 0x3cc   :  { %v869_v26 = vpop.eup %868  ;;  %v484_v27 = vadd.f32 %v827_v13, %v483_v25  ;;  %v608_v25 = vld [vmem:[%s1227_s11] sm:$0xff] }
 0x3cd   :  { %v496_v28 = vmul.f32 %v869_v26, %v828_v20 }
 0x3ce   :  { %870 = vtanh.f32 %v484_v27 }
 0x3cf   :  { %v505_v17 = vsel %vm498_vm3, %v496_v28, 0.0  ;;  %872 = vtanh.f32 %v475_v29  ;;  %v607_v29 = vld [vmem:[%s1229_s10] sm:$0xf] }
 0x3d0   :  { %506 = vadd.xlane.f32.xlu2 %v505_v17 }
 0x3d4   :  { %v871_v18 = vpop.eup %870 }
 0x3d5   :  { %v497_v30 = vmul.f32 %v871_v18, %v828_v20  ;;  %v873_v32 = vpop.eup %872 }
 0x3d6   :  { %v494_v33 = vmul.f32 %v873_v32, %v828_v20 }
 0x3d7   :  { %v508_v31 = vsel %vm498_vm3, %v497_v30, 0.0  ;;  %v830_v30 = vld [vmem:[%s1228_s12] ss:$0 sm:$0xff] }
 0x3d8   :  { %509 = vadd.xlane.f32.xlu0 %v508_v31  ;;  %v499_v34 = vsel %vm498_vm3, %v494_v33, 0.0  ;;  %v831_v33 = vld [vmem:[%s1230_s13] ss:$0 sm:$0xff] }
 0x3e0   :  { %500 = vadd.xlane.f32.xlu0 %v499_v34 }
 0x43b   :  { %v504_v37 = vpop.xlane.xlu1 %503 }
 0x43c   :  { %v516_v38 = vadd.f32 %v829_v36, %v504_v37  ;;  %v24_v37 = vstv %s1231_s14 }
 0x43d   :  { %25 = vst [vmem:[#allocation3] sm:$0x1] %v24_v37 }
 0x43e   :  { %v521_v39 = vmul.f32 1.442695, %v516_v38 }
 0x440   :  { %874 = vpow2.f32 %v521_v39 }
 0x443   :  { %v507_v40 = vpop.xlane.xlu2 %506 }
 0x444   :  { %v517_v41 = vadd.f32 %v829_v36, %v507_v40 }
 0x446   :  { %v875_v43 = vpop.eup %874  ;;  %v523_v44 = vmul.f32 1.442695, %v517_v41 }
 0x447   :  { %v532_v45 = vmul.f32 %v875_v43, %v528_v42  ;;  %v832_v43 = vld [vmem:[#allocation3] ss:$0 sm:$0xff] }
 0x448   :  { %876 = vpow2.f32 %v523_v44 }
 0x449   :  { %543 = vperm.xlu2 %813, %v532_v45  }
 0x44b   :  { %v510_v46 = vpop.xlane.xlu0 %509 }
 0x44c   :  { %v518_v47 = vadd.f32 %v829_v36, %v510_v46 }
 0x44e   :  { %v877_v49 = vpop.eup %876  ;;  %v525_v50 = vmul.f32 1.442695, %v518_v47 }
 0x44f   :  { %v533_v51 = vmul.f32 %v877_v49, %v529_v48 }
 0x450   :  { %878 = vpow2.f32 %v525_v50 }
 0x451   :  { %548 = vperm.xlu0 %812, %v533_v51  }
 0x453   :  { %v501_v52 = vpop.xlane.xlu0 %500 }
 0x454   :  { %v515_v53 = vadd.f32 %v829_v36, %v501_v52 }
 0x456   :  { %v879_v55 = vpop.eup %878  ;;  %v519_v56 = vmul.f32 1.442695, %v515_v53 }
 0x457   :  { %v534_v57 = vmul.f32 %v879_v55, %v530_v54  ;;  %v714_v55 = vld [vmem:[%s1233_s15 + $0x20] sm:$0xff] }
 0x458   :  { %880 = vpow2.f32 %v519_v56  ;;  %v713_v56 = vld [vmem:[%s1233_s15 + $0x18] sm:$0xff] }
 0x459   :  { %553 = vperm.xlu2 %813, %v534_v57   ;;  %v814_v58 = vpack.i.bf16 %v533_v51, %v534_v57  ;;  %v712_v57 = vld [vmem:[%s1233_s15 + $0x10] sm:$0xff] }
 0x45b   :  { %815 = vrot.lane.b32.xlu1 %v814_v58, %s901_s27  ;;  %v711_v58 = vld [vmem:[%s1233_s15 + $0x8] sm:$0xff] }
 0x45e   :  { %v881_v60 = vpop.eup %880 }
 0x45f   :  { %v531_v61 = vmul.f32 %v881_v60, %v527_v59  ;;  %v710_v59 = vld [vmem:[%s1233_s15] sm:$0xff] }
 0x461   :  { %538 = vperm.xlu2 %813, %v531_v61   ;;  %v819_v62 = vpack.i.bf16 %v531_v61, %v532_v45 }
 0x463   :  { %820 = vrot.lane.b32.xlu1 %v819_v62, %s901_s27 }
 0x469   :  { %824 = vset.pattern.permute.xlu2 %v902_v22 }
 0x4a3   :  { %v544_v63 = vpop.permute.xlu2 %543 }
 0x4a4   :  { %v557_v15 = vmul.f32 %v544_v63, %v1109_v5  ;;  %v612_v5 = vld [vmem:[%s1227_s11 + $0x20] sm:$0xff] }
 0x4a5   :  { %631 = vmatpush.msrb.mxu3 %v612_v5 }
 0x4b3   :  { %v554_v0 = vpop.permute.xlu2 %553 }
 0x4b4   :  { %v559_v4 = vmul.f32 %v554_v0, %v1119_v11 }
 0x4bb   :  { %v539_v13 = vpop.permute.xlu2 %538 }
 0x4bc   :  { %v556_v20 = vmul.f32 %v539_v13, %v1104_v2  ;;  %v611_v2 = vld [vmem:[%s1227_s11 + $0x18] sm:$0xff] }
 0x4bd   :  { %632 = vmatpush.msrb.mxu3 %v611_v2 }
 0x4bf   :  { %633 = vmatpush.msrb.mxu3 %v610_v23 }
 0x4c1   :  { %634 = vmatpush.msrb.mxu3 %v609_v24 }
 0x4c3   :  { %v549_v1 = vpop.permute.xlu0 %548  ;;  %635 = vmatpush.msrb.mxu3 %v608_v25 }
 0x4c4   :  { %v558_v9 = vmul.f32 %v549_v1, %v1114_v8  ;;  %v535_v8 = vld [vmem:[%s1226_s3] sm:$0xf] }
 0x4c5   :  { %733 = vmatpush.msra.mxu3 %v714_v55 }
 0x4c7   :  { %734 = vmatpush.msra.mxu3 %v713_v56 }
 0x4c9   :  { %735 = vmatpush.msra.mxu3 %v712_v57 }
 0x4cb   :  { %736 = vmatpush.msra.mxu3 %v711_v58 }
 0x4cd   :  { %v816_v3 = vpop.permute.xlu1 %815  ;;  %737 = vmatpush.msra.mxu3 %v710_v59 }
 0x4ce   :  { %v818_v6 = vunpack.i.h.bf16 %v816_v3  ;;  %v817_v7 = vunpack.i.l.bf16 %v816_v3 }
 0x4d0   :  { %v575_v10 = vsel %vm444_vm2, %v559_v4, %v817_v7  ;;  %v574_v12 = vsel %vm444_vm2, %v558_v9, %v818_v6  ;;  %v833_v4 = vld [vmem:[%s1232_s16] ss:$0 sm:$0xff] }
 0x4d1   :  { %591 = vmatpush.msrb.mxu1 %v575_v10 }
 0x4d3   :  { %592 = vmatpush.msrb.mxu1 %v574_v12 }
 0x4d5   :  { %v821_v14 = vpop.permute.xlu1 %820 }
 0x4d6   :  { %v823_v16 = vunpack.i.h.bf16 %v821_v14  ;;  %v822_v19 = vunpack.i.l.bf16 %v821_v14 }
 0x4d8   :  { %v573_v11 = vsel %vm444_vm2, %v557_v15, %v822_v19  ;;  %v572_v21 = vsel %vm444_vm2, %v556_v20, %v823_v16 }
 0x4d9   :  { %593 = vmatpush.msrb.mxu1 %v573_v11 }
 0x4db   :  { %594 = vmatpush.msrb.mxu1 %v572_v21 }
 0x4dc   :  { %779 = vmatmul.msk.f32.vlgmr.msrb.gmra.mxu1 %vm76_vm0, %v535_v8 }
 0x4dd   :  { %671 = vmatpush.msra.mxu1 %v612_v5 }
 0x4df   :  { %672 = vmatpush.msra.mxu1 %v611_v2 }
 0x4e1   :  { %673 = vmatpush.msra.mxu1 %v610_v23 }
 0x4e3   :  { %674 = vmatpush.msra.mxu1 %v609_v24 }
 0x4e5   :  { %675 = vmatpush.msra.mxu1 %v608_v25 }
 0x4e6   :  { %781 = vmatmul.msk.f32.vlgmr.msra.gmra.mxu1 %vm444_vm2, %v607_v29 }
 0x559   :  { %v596_v26 = vpop.f32.mrf.mxu1 }
 0x55a   :  { %v599_v27 = vadd.f32 1e-08, %v596_v26 }
 0x55c   :  { %882 = vrcp.f32 %v599_v27 }
 0x562   :  { %v883_v28 = vpop.eup %882 }
 0x563   :  { %603 = vperm.xlu2 %824, %v883_v28   ;;  %v677_v31 = vpop.f32.mrf.mxu1 }
 0x564   :  { %v678_v32 = vadd.f32 %v830_v30, %v677_v31 }
 0x566   :  { %884 = vtanh.f32 %v678_v32 }
 0x56b   :  { %825 = vset.pattern.permute.xlu2 %v900_v35 }
 0x56c   :  { %v885_v34 = vpop.eup %884 }
 0x56d   :  { %v681_v35 = vmul.f32 %v885_v34, %v831_v33 }
 0x56f   :  { %v682_v36 = vsel %vm646_vm4, %v681_v35, 0.0 }
 0x570   :  { %683 = vadd.xlane.f32.xlu0 %v682_v36 }
 0x5bd   :  { %v604_v17 = vpop.permute.xlu2 %603 }
 0x5be   :  { %v606_v18 = vmul.f32 %v604_v17, %v596_v26 }
 0x5c0   :  { %780 = vmatmul.msk.f32.vlgmr.msrb.gmra.mxu3 %vm444_vm2, %v606_v18 }
 0x5e3   :  { %v684_v44 = vpop.xlane.xlu0 %683 }
 0x5e4   :  { %v685_v45 = vadd.f32 %v832_v43, %v684_v44 }
 0x5e6   :  { %v686_v46 = vmul.f32 1.442695, %v685_v45 }
 0x643   :  { %v637_v38 = vpop.f32.mrf.mxu3 }
 0x644   :  { %v638_v39 = vadd.f32 %v830_v30, %v637_v38 }
 0x646   :  { %886 = vtanh.f32 %v638_v39 }
 0x647   :  { %888 = vpow2.f32 %v686_v46 }
 0x64c   :  { %v887_v40 = vpop.eup %886 }
 0x64d   :  { %v645_v41 = vmul.f32 %v887_v40, %v831_v33  ;;  %v889_v47 = vpop.eup %888 }
 0x64e   :  { %699 = vperm.xlu2 %825, %v889_v47  }
 0x64f   :  { %v647_v42 = vsel %vm646_vm4, %v645_v41, 0.0 }
 0x650   :  { %648 = vadd.xlane.f32.xlu1 %v647_v42 }
 0x6a8   :  { %v700_v60 = vpop.permute.xlu2 %699 }
 0x6a9   :  { %v702_v63 = vmul.f32 %v700_v60, %v607_v29 }
 0x6c3   :  { %v649_v48 = vpop.xlane.xlu1 %648 }
 0x6c4   :  { %v654_v49 = vadd.f32 %v832_v43, %v649_v48 }
 0x6c6   :  { %v655_v50 = vmul.f32 1.442695, %v654_v49 }
 0x6c8   :  { %890 = vpow2.f32 %v655_v50 }
 0x6ce   :  { %v891_v51 = vpop.eup %890 }
 0x6cf   :  { %v688_v52 = vadd.f32 %v891_v51, %v889_v47  ;;  %693 = vperm.xlu2 %825, %v891_v51  }
 0x6d1   :  { %v689_v53 = vadd.f32 1e-08, %v688_v52 }
 0x6d3   :  { %892 = vrcp.f32 %v689_v53 }
 0x6d9   :  { %v893_v54 = vpop.eup %892 }
 0x6da   :  { %706 = vperm.xlu2 %825, %v893_v54  }
 0x729   :  { %v694_v61 = vpop.permute.xlu2 %693 }
 0x72a   :  { %v696_v62 = vmul.f32 %v694_v61, %v606_v18 }
 0x72c   :  { %v703_v0 = vadd.f32 %v702_v63, %v696_v62 }
 0x734   :  { %v707_v1 = vpop.permute.xlu2 %706 }
 0x735   :  { %v709_v3 = vmul.f32 %v707_v1, %v703_v0 }
 0x737   :  { %782 = vmatmul.msk.f32.vlgmr.msra.gmra.mxu3 %vm444_vm2, %v709_v3 }
 0x7ba   :  { %v739_v6 = vpop.f32.mrf.mxu3 }
 0x7bb   :  { %v740_v7 = vadd.f32 %v833_v4, %v739_v6 }
 0x7bd   :  { %742 = vst.msk [vmem:[%s1234_s17] sm:$0xf] %vm646_vm4, %v740_v7 }

// kernel: model_bert_forward.3
= control target key start
LH: loop header
LB: loop body
LE: loop exit
PB: predicated region body
PF: predicated region fallthrough
CT: control target
= control target key end

     0   :  { %s779_s0 = inlined_call_operand.vmem [shape: f32[2,5,16], index: 0, kind: input, shape index: {}]   ;;  %s780_s1 = inlined_call_operand.vmem [shape: f32[2,4,5], index: 1, kind: input, shape index: {}]   ;;  %s781_s2 = inlined_call_operand.vmem [shape: f32[2,4,3,16], index: 2, kind: input, shape index: {}]   ;;  %s782_s3 = inlined_call_operand.vmem [shape: f32[2,4,1], index: 3, kind: input, shape index: {}]   ;;  %s783_s4 = inlined_call_operand.vmem [shape: f32[16,16], index: 4, kind: input, shape index: {}]   ;;  %s784_s5 = inlined_call_operand.vmem [shape: f32[1,16], index: 5, kind: input, shape index: {}]   ;;  %s785_s6 = inlined_call_operand.vmem [shape: f32[1,16], index: 6, kind: input, shape index: {}]   ;;  %s786_s7 = inlined_call_operand.<no memory space> [shape: f32[1,1], index: 7, kind: input, shape index: {}]   ;;  %s787_s8 = inlined_call_operand.hbm [shape: f32[1,1], index: 8, kind: output, shape index: {}]  }
   0x1   :  { %v13_v0 = vstv %s786_s7 }
   0x2   :  { %14 = vst [vmem:[#allocation2] sm:$0x1] %v13_v0 }
   0x3   :  { %v33_v1 = vld [vmem:[%s783_s4 + $0x8] sm:$0xff]  ;;  %v32_v2 = vld [vmem:[%s783_s4] sm:$0xff]  ;;  %vm43_vm0 = vcmask 130048  }
   0x4   :  { %288 = vmatpush.msra.mxu2 %v33_v1  ;;  %v655_v3 = vld [vmem:[%s779_s0 + $0x8] sm:$0x1f]  ;;  %61 = vmatpush.msra.mxu0 %v33_v1  ;;  %v38_v4 = vld [vmem:[%s779_s0] sm:$0x1f] }
   0x5   :  { %15 = vsyncpa [#allocation4], 0  ;;  %v535_v6 = vld [vmem:[%s784_s5] ss:$0 sm:$0xff]  ;;  %vm72_vm1 = vcmask 126976   ;;  %v80_v18 = vlaneseq  ;;  %vm90_vm3 = vcmask 35840  }
   0x6   :  { %289 = vmatpush.msra.mxu2 %v32_v2  ;;  %62 = vmatpush.msra.mxu0 %v32_v2  ;;  %v536_v11 = vld [vmem:[%s785_s6] ss:$0 sm:$0xff]  ;;  %v515_v21 = vld [vmem:[%s780_s1 + $0x4] sm:$0xf]  ;;  %vm106_vm5 = vcmask 1044480   ;;  %vm102_vm6 = vcmask 39936  }
   0x7   :  { %516 = vmatmul.msk.f32.vlgmr.msra.gmra.mxu2 %vm43_vm0, %v655_v3  ;;  %511 = vmatmul.msk.f32.vlgmr.msra.gmra.mxu0 %vm43_vm0, %v38_v4  ;;  %v81_v20 = vand.u32 127, %v80_v18  ;;  %vm300_vm2 = vcmp.eq.f32.partialorder %v515_v21, 0.0  ;;  %v39_v27 = vld [vmem:[%s780_s1] sm:$0xf]  ;;  %v681_v49 = vld [vmem:[%s781_s2 + $0x14] sm:$0x7] }
   0x8   :  { %vm78_vm4 = vcmp.eq.f32.partialorder %v39_v27, 0.0  ;;  %517 = vmatpush.msk.msra.mxu3 %vm106_vm5, %v655_v3  ;;  %512 = vmatpush.msk.msra.mxu1 %vm106_vm5, %v38_v4  ;;  %v686_v50 = vld [vmem:[%s781_s2 + $0x10] sm:$0x7]  ;;  %vm84_vm7 = vcmask 1042434   ;;  %vm86_vm8 = vcmask 1043459   ;;  %vm175_vm9 = vcmask 1044484  }
   0x9   :  { %v36_v5 = vld [vmem:[#allocation2] sm:$0x1]  ;;  %vm178_vm10 = vcmask 126977   ;;  %v693_v52 = vld [vmem:[%s781_s2 + $0x1c] sm:$0x7]  ;;  %vm83_vm11 = vcmask 1041409  }
   0xa   :  { %524 = vpush %v36_v5  ;;  %v130_v57 = vld [vmem:[%s781_s2 + $0x4] sm:$0x7]  ;;  %v521_v59 = vld [vmem:[%s781_s2 + $0x18] sm:$0x7]  ;;  %v132_v3 = vld [vmem:[%s781_s2 + $0xc] sm:$0x7] }
   0xb   :  { %v129_v4 = vld [vmem:[%s781_s2] sm:$0x7]  ;;  %vm156_vm12 = vcmask 125952   ;;  %vm197_vm13 = vcmask 1045509   ;;  %vm200_vm14 = vcmask 128002   ;;  %vm242_vm15 = vcmask 3072  }
   0xc   :  { %s597_s0 = smov [#allocation3]   ;;  %s502_s6 = sshll.u32 %s787_s8, 4  ;;  %s503_s6 = int_to_ptr.hbm [resolvable:$true] %s502_s6 }
  0x3b   :  { %s525_s5 = spop %524 }
  0x3c   :  { %v76_v19 = vstv %s525_s5  ;;  %s500_s5 = sshll.u32 %s597_s0, 4  ;;  %s501_s5 = int_to_ptr.vmem [resolvable:$true] %s500_s5 }
  0x84   :  { %v64_v7 = vpop.f32.mrf.mxu0 }
  0x85   :  { %v65_v10 = vadd.f32 %v535_v6, %v64_v7 }
  0x8a   :  { %v291_v8 = vpop.f32.mrf.mxu2 }
  0x8b   :  { %v292_v9 = vadd.f32 %v535_v6, %v291_v8 }
  0x8d   :  { %537 = vtanh.f32 %v292_v9 }
  0x8e   :  { %539 = vtanh.f32 %v65_v10 }
  0x93   :  { %v538_v12 = vpop.eup %537 }
  0x94   :  { %v295_v13 = vmul.f32 %v538_v12, %v536_v11  ;;  %v540_v14 = vpop.eup %539  ;;  %v131_v12 = vld [vmem:[%s781_s2 + $0x8] sm:$0x7] }
  0x95   :  { %v71_v16 = vmul.f32 %v540_v14, %v536_v11 }
  0x96   :  { %v296_v15 = vsel %vm72_vm1, %v295_v13, 0.0 }
  0x97   :  { %297 = vadd.xlane.f32.xlu0 %v296_v15  ;;  %v73_v17 = vsel %vm72_vm1, %v71_v16, 0.0 }
  0x9f   :  { %74 = vadd.xlane.f32.xlu0 %v73_v17 }
 0x10a   :  { %v298_v22 = vpop.xlane.xlu0 %297 }
 0x10b   :  { %v299_v23 = vadd.f32 %v298_v22, %v76_v19 }
 0x10d   :  { %v302_v24 = vperm.slane %v299_v23, %v81_v20 }
 0x10f   :  { %v306_v25 = vsel %vm300_vm2, -1e+08, %v302_v24 }
 0x110   :  { %v307_v26 = vsel %vm90_vm3, %v306_v25, -inf }
 0x111   :  { %308 = vmax.xlane.f32.xlu1 %v307_v26 }
 0x112   :  { %v75_v28 = vpop.xlane.xlu0 %74 }
 0x113   :  { %v77_v29 = vadd.f32 %v76_v19, %v75_v28 }
 0x115   :  { %v82_v30 = vperm.slane %v77_v29, %v81_v20 }
 0x117   :  { %v89_v31 = vsel %vm78_vm4, -1e+08, %v82_v30  ;;  %vm493_vm4 = vcmask 0  }
 0x118   :  { %v91_v32 = vsel %vm90_vm3, %v89_v31, -inf }
 0x119   :  { %92 = vmax.xlane.f32.xlu1 %v91_v32 }
 0x184   :  { %v309_v33 = vpop.xlane.xlu1 %308 }
 0x185   :  { %v310_v34 = vsub.f32 %v306_v25, %v309_v33 }
 0x187   :  { %v311_v35 = vmul.f32 1.442695, %v310_v34 }
 0x189   :  { %541 = vpow2.f32 %v311_v35 }
 0x18c   :  { %v93_v36 = vpop.xlane.xlu1 %92 }
 0x18d   :  { %v94_v37 = vsub.f32 %v89_v31, %v93_v36 }
 0x18f   :  { %v542_v38 = vpop.eup %541  ;;  %v95_v39 = vmul.f32 1.442695, %v94_v37 }
 0x190   :  { %v313_v40 = vsel %vm90_vm3, %v542_v38, 0.0 }
 0x191   :  { %543 = vpow2.f32 %v95_v39  ;;  %314 = vadd.xlane.f32.xlu2 %v313_v40 }
 0x197   :  { %v544_v41 = vpop.eup %543 }
 0x198   :  { %v97_v42 = vsel %vm90_vm3, %v544_v41, 0.0 }
 0x199   :  { %98 = vadd.xlane.f32.xlu2 %v97_v42 }
 0x204   :  { %v315_v43 = vpop.xlane.xlu2 %314 }
 0x205   :  { %545 = vrcp.f32 %v315_v43 }
 0x20b   :  { %v546_v44 = vpop.eup %545 }
 0x20c   :  { %v99_v45 = vpop.xlane.xlu2 %98  ;;  %v317_v46 = vmul.f32 %v546_v44, %v542_v38 }
 0x20d   :  { %547 = vrcp.f32 %v99_v45 }
 0x20e   :  { %518 = vmatmul.msk.f32.vlgmr.msra.gmra.mxu3 %vm102_vm6, %v317_v46 }
 0x213   :  { %v548_v47 = vpop.eup %547 }
 0x214   :  { %v101_v48 = vmul.f32 %v548_v47, %v544_v41 }
 0x216   :  { %513 = vmatmul.msk.f32.vlgmr.msra.gmra.mxu1 %vm102_vm6, %v101_v48 }
 0x291   :  { %v688_v51 = vpop.f32.mrf.mxu3 }
 0x292   :  { %v696_v53 = vrot.slane %v688_v51, 1  ;;  %v350_v54 = vrot.slane %v688_v51, 2  ;;  %v374_v55 = vrot.slane %v688_v51, 7  ;;  %v377_v56 = vmul.f32 %v681_v49, %v688_v51 }
 0x293   :  { %v705_v58 = vpop.f32.mrf.mxu1  ;;  %v351_v60 = vrot.slane %v688_v51, 3  ;;  %v356_v61 = vmul.f32 %v686_v50, %v688_v51  ;;  %v394_v62 = vrot.slane %v688_v51, 6  ;;  %v398_v45 = vmul.f32 %v521_v59, %v688_v51 }
 0x294   :  { %v376_v63 = vmul.f32 %v686_v50, %v374_v55  ;;  %v378_v0 = vmul.f32 %v521_v59, %v696_v53  ;;  %v379_v1 = vmul.f32 %v693_v52, %v350_v54  ;;  %v384_v2 = vrot.slane %v377_v56, 7 }
 0x295   :  { %v134_v5 = vrot.slane %v705_v58, 1  ;;  %v135_v6 = vrot.slane %v705_v58, 2  ;;  %v160_v7 = vrot.slane %v705_v58, 7  ;;  %v163_v8 = vmul.f32 %v130_v57, %v705_v58 }
 0x296   :  { %v385_v9 = vsel %vm84_vm7, %v384_v2, %v376_v63  ;;  %v386_v10 = vrot.slane %v378_v0, 6  ;;  %v388_v11 = vrot.slane %v379_v1, 5  ;;  %v136_v13 = vrot.slane %v705_v58, 3 }
 0x297   :  { %v162_v14 = vmul.f32 %v160_v7, %v129_v4  ;;  %v164_v15 = vmul.f32 %v134_v5, %v131_v12  ;;  %v165_v16 = vmul.f32 %v135_v6, %v132_v3  ;;  %v170_v17 = vrot.slane %v163_v8, 7 }
 0x298   :  { %v387_v18 = vsel %vm86_vm8, %v386_v10, %v385_v9  ;;  %v141_v19 = vmul.f32 %v129_v4, %v705_v58  ;;  %v142_v20 = vmul.f32 %v134_v5, %v130_v57  ;;  %v143_v21 = vmul.f32 %v135_v6, %v131_v12 }
 0x299   :  { %v389_v22 = vsel %vm175_vm9, %v388_v11, %v387_v18  ;;  %v171_v23 = vsel %vm84_vm7, %v170_v17, %v162_v14  ;;  %v172_v24 = vrot.slane %v164_v15, 6  ;;  %v174_v25 = vrot.slane %v165_v16, 5 }
 0x29a   :  { %v391_v26 = vsel %vm178_vm10, %v389_v22, 0.0  ;;  %v144_v27 = vmul.f32 %v136_v13, %v132_v3  ;;  %v149_v28 = vrot.slane %v142_v20, 7  ;;  %v151_v29 = vrot.slane %v143_v21, 6 }
 0x29b   :  { %392 = vadd.xlane.f32.xlu1 %v391_v26  ;;  %v173_v30 = vsel %vm86_vm8, %v172_v24, %v171_v23  ;;  %v357_v31 = vmul.f32 %v681_v49, %v696_v53  ;;  %v358_v32 = vmul.f32 %v521_v59, %v350_v54  ;;  %v359_v33 = vmul.f32 %v693_v52, %v351_v60 }
 0x29c   :  { %v176_v34 = vsel %vm175_vm9, %v174_v25, %v173_v30  ;;  %v150_v35 = vsel %vm83_vm11, %v149_v28, %v141_v19  ;;  %v153_v36 = vrot.slane %v144_v27, 5  ;;  %v182_v37 = vrot.slane %v705_v58, 6 }
 0x29d   :  { %v179_v38 = vsel %vm178_vm10, %v176_v34, 0.0  ;;  %v152_v39 = vsel %vm84_vm7, %v151_v29, %v150_v35  ;;  %v364_v40 = vrot.slane %v357_v31, 7  ;;  %v366_v41 = vrot.slane %v358_v32, 6 }
 0x29e   :  { %180 = vadd.xlane.f32.xlu0 %v179_v38  ;;  %v154_v42 = vsel %vm86_vm8, %v153_v36, %v152_v39  ;;  %v368_v43 = vrot.slane %v359_v33, 5  ;;  %v185_v44 = vmul.f32 %v160_v7, %v130_v57  ;;  %v186_v48 = vmul.f32 %v131_v12, %v705_v58 }
 0x29f   :  { %v157_v46 = vsel %vm156_vm12, %v154_v42, 0.0  ;;  %v365_v47 = vsel %vm83_vm11, %v364_v40, %v356_v61  ;;  %v187_v54 = vmul.f32 %v134_v5, %v132_v3  ;;  %v184_v60 = vmul.f32 %v182_v37, %v129_v4  ;;  %v240_v37 = vld [vmem:[%s782_s3] sm:$0xf] }
 0x2a0   :  { %158 = vadd.xlane.f32.xlu2 %v157_v46  ;;  %v367_v56 = vsel %vm84_vm7, %v366_v41, %v365_v47  ;;  %v192_v63 = vrot.slane %v185_v44, 7  ;;  %v397_v0 = vmul.f32 %v681_v49, %v374_v55  ;;  %v194_v1 = vrot.slane %v186_v48, 6 }
 0x2a1   :  { %v369_v57 = vsel %vm86_vm8, %v368_v43, %v367_v56  ;;  %v396_v59 = vmul.f32 %v686_v50, %v394_v62  ;;  %v399_v61 = vmul.f32 %v693_v52, %v696_v53  ;;  %v196_v3 = vrot.slane %v187_v54, 5 }
 0x2a2   :  { %v371_v58 = vsel %vm156_vm12, %v369_v57, 0.0  ;;  %v193_v2 = vsel %vm86_vm8, %v192_v63, %v184_v60  ;;  %v404_v5 = vrot.slane %v397_v0, 7  ;;  %v406_v51 = vrot.slane %v398_v45, 6 }
 0x2a3   :  { %372 = vadd.xlane.f32.xlu1 %v371_v58  ;;  %v195_v4 = vsel %vm175_vm9, %v194_v1, %v193_v2  ;;  %v408_v6 = vrot.slane %v399_v61, 5  ;;  %v255_v39 = vsel %vm242_vm15, %v240_v37, 0.0 }
 0x2a4   :  { %v198_v49 = vsel %vm197_vm13, %v196_v3, %v195_v4  ;;  %v405_v55 = vsel %vm86_vm8, %v404_v5, %v396_v59 }
 0x2a5   :  { %v201_v50 = vsel %vm200_vm14, %v198_v49, 0.0  ;;  %v407_v62 = vsel %vm175_vm9, %v406_v51, %v405_v55  ;;  %v523_v55 = vld [vmem:[%s782_s3 + $0x4] sm:$0xf] }
 0x2a6   :  { %202 = vadd.xlane.f32.xlu0 %v201_v50  ;;  %v409_v52 = vsel %vm197_vm13, %v408_v6, %v407_v62 }
 0x2a7   :  { %v411_v53 = vsel %vm200_vm14, %v409_v52, 0.0 }
 0x2a8   :  { %412 = vadd.xlane.f32.xlu2 %v411_v53  ;;  %v465_v53 = vsel %vm242_vm15, %v523_v55, 0.0 }
 0x2ab   :  { %256 = vadd.xlane.f32.xlu1 %v255_v39 }
 0x30e   :  { %v393_v7 = vpop.xlane.xlu1 %392 }
 0x30f   :  { %v415_v13 = vrot.slane %v393_v7, 1 }
 0x311   :  { %v181_v8 = vpop.xlane.xlu0 %180 }
 0x312   :  { %v205_v10 = vrot.slane %v181_v8, 1 }
 0x313   :  { %v159_v9 = vpop.xlane.xlu2 %158 }
 0x314   :  { %v207_v14 = vmax.f32 %v159_v9, %v205_v10 }
 0x316   :  { %v373_v11 = vpop.xlane.xlu1 %372 }
 0x317   :  { %v417_v17 = vmax.f32 %v373_v11, %v415_v13 }
 0x319   :  { %v203_v12 = vpop.xlane.xlu0 %202 }
 0x31a   :  { %v209_v15 = vrot.slane %v203_v12, 2 }
 0x31b   :  { %v413_v16 = vpop.xlane.xlu2 %412 }
 0x31c   :  { %v211_v18 = vmax.f32 %v207_v14, %v209_v15  ;;  %v419_v19 = vrot.slane %v413_v16, 2 }
 0x31e   :  { %v212_v20 = vsub.f32 %v159_v9, %v211_v18  ;;  %v216_v21 = vrot.slane %v211_v18, 7  ;;  %v221_v22 = vrot.slane %v211_v18, 6  ;;  %v421_v23 = vmax.f32 %v417_v17, %v419_v19 }
 0x320   :  { %v218_v24 = vsub.f32 %v181_v8, %v216_v21  ;;  %v223_v25 = vsub.f32 %v203_v12, %v221_v22  ;;  %v422_v26 = vsub.f32 %v373_v11, %v421_v23  ;;  %v426_v27 = vrot.slane %v421_v23, 7 }
 0x321   :  { %v431_v28 = vrot.slane %v421_v23, 6  ;;  %v213_v29 = vmul.f32 1.442695, %v212_v20 }
 0x322   :  { %v219_v30 = vmul.f32 1.442695, %v218_v24  ;;  %v224_v31 = vmul.f32 1.442695, %v223_v25  ;;  %v428_v32 = vsub.f32 %v393_v7, %v426_v27  ;;  %v423_v34 = vmul.f32 1.442695, %v422_v26  ;;  %v257_v7 = vpop.xlane.xlu1 %256 }
 0x323   :  { %v433_v33 = vsub.f32 %v413_v16, %v431_v28  ;;  %v258_v8 = vrot.slane %v257_v7, 4 }
 0x324   :  { %549 = vpow2.f32 %v219_v30  ;;  %v429_v35 = vmul.f32 1.442695, %v428_v32 }
 0x325   :  { %551 = vpow2.f32 %v224_v31  ;;  %v434_v36 = vmul.f32 1.442695, %v433_v33  ;;  %v259_v9 = vadd.f32 %v258_v8, %v257_v7 }
 0x326   :  { %553 = vpow2.f32 %v213_v29 }
 0x327   :  { %555 = vpow2.f32 %v429_v35  ;;  %v260_v10 = vrot.slane %v259_v9, 2 }
 0x328   :  { %557 = vpow2.f32 %v434_v36 }
 0x329   :  { %559 = vpow2.f32 %v423_v34  ;;  %v261_v13 = vadd.f32 %v260_v10, %v259_v9 }
 0x32a   :  { %v550_v38 = vpop.eup %549 }
 0x32b   :  { %v552_v40 = vpop.eup %551  ;;  %v227_v41 = vrot.slane %v550_v38, 1  ;;  %v262_v19 = vrot.slane %v261_v13, 1 }
 0x32c   :  { %v554_v42 = vpop.eup %553  ;;  %v231_v45 = vrot.slane %v552_v40, 2 }
 0x32d   :  { %v556_v43 = vpop.eup %555  ;;  %v229_v44 = vadd.f32 %v554_v42, %v227_v41  ;;  %v263_v26 = vadd.f32 %v262_v19, %v261_v13 }
 0x32e   :  { %v558_v46 = vpop.eup %557  ;;  %v437_v47 = vrot.slane %v556_v43, 1 }
 0x32f   :  { %v560_v48 = vpop.eup %559  ;;  %v233_v54 = vadd.f32 %v231_v45, %v229_v44  ;;  %v441_v60 = vrot.slane %v558_v46, 2 }
 0x330   :  { %v439_v56 = vadd.f32 %v560_v48, %v437_v47 }
 0x331   :  { %561 = vrcp.f32 %v233_v54 }
 0x332   :  { %v443_v63 = vadd.f32 %v441_v60, %v439_v56 }
 0x334   :  { %563 = vrcp.f32 %v443_v63 }
 0x337   :  { %v562_v0 = vpop.eup %561 }
 0x338   :  { %v235_v57 = vmul.f32 %v562_v0, %v554_v42 }
 0x33a   :  { %v564_v1 = vpop.eup %563  ;;  %v236_v59 = vadd.f32 1e-09, %v235_v57 }
 0x33b   :  { %v445_v61 = vmul.f32 %v564_v1, %v560_v48 }
 0x33c   :  { %565 = vlog2.f32 %v236_v59 }
 0x33d   :  { %v446_v58 = vadd.f32 1e-09, %v445_v61 }
 0x33f   :  { %567 = vlog2.f32 %v446_v58 }
 0x342   :  { %v566_v2 = vpop.eup %565 }
 0x343   :  { %v238_v3 = vmul.f32 0.6931472, %v566_v2 }
 0x345   :  { %v568_v5 = vpop.eup %567  ;;  %v239_v4 = vsub.f32 0.0, %v238_v3 }
 0x346   :  { %v448_v51 = vmul.f32 0.6931472, %v568_v5 }
 0x347   :  { %v241_v49 = vmul.f32 %v240_v37, %v239_v4 }
 0x348   :  { %v449_v6 = vsub.f32 0.0, %v448_v51 }
 0x349   :  { %v243_v50 = vsel %vm242_vm15, %v241_v49, 0.0 }
 0x34a   :  { %244 = vadd.xlane.f32.xlu0 %v243_v50  ;;  %v452_v62 = vmul.f32 %v523_v55, %v449_v6 }
 0x34c   :  { %v453_v52 = vsel %vm242_vm15, %v452_v62, 0.0 }
 0x34d   :  { %454 = vadd.xlane.f32.xlu2 %v453_v52 }
 0x352   :  { %466 = vadd.xlane.f32.xlu0 %v465_v53 }
 0x3bd   :  { %v245_v11 = vpop.xlane.xlu0 %244 }
 0x3be   :  { %v246_v12 = vrot.slane %v245_v11, 4 }
 0x3c0   :  { %v247_v14 = vadd.f32 %v246_v12, %v245_v11  ;;  %v455_v15 = vpop.xlane.xlu2 %454 }
 0x3c1   :  { %v456_v16 = vrot.slane %v455_v15, 4 }
 0x3c2   :  { %v248_v17 = vrot.slane %v247_v14, 2 }
 0x3c3   :  { %v457_v18 = vadd.f32 %v456_v16, %v455_v15 }
 0x3c4   :  { %v249_v20 = vadd.f32 %v248_v17, %v247_v14 }
 0x3c5   :  { %v458_v21 = vrot.slane %v457_v18, 2  ;;  %v467_v22 = vpop.xlane.xlu0 %466 }
 0x3c6   :  { %v468_v23 = vrot.slane %v467_v22, 4  ;;  %v250_v24 = vrot.slane %v249_v20, 1 }
 0x3c7   :  { %v459_v25 = vadd.f32 %v458_v21, %v457_v18 }
 0x3c8   :  { %v469_v27 = vadd.f32 %v468_v23, %v467_v22  ;;  %v251_v28 = vadd.f32 %v250_v24, %v249_v20 }
 0x3c9   :  { %v460_v29 = vrot.slane %v459_v25, 1 }
 0x3ca   :  { %v470_v30 = vrot.slane %v469_v27, 2  ;;  %526 = vpush %v251_v28 }
 0x3cb   :  { %528 = vpush %v263_v26  ;;  %v461_v31 = vadd.f32 %v460_v29, %v459_v25 }
 0x3cc   :  { %v471_v32 = vadd.f32 %v470_v30, %v469_v27 }
 0x3cd   :  { %530 = vpush %v461_v31 }
 0x3ce   :  { %v472_v33 = vrot.slane %v471_v32, 1 }
 0x3d0   :  { %v473_v34 = vadd.f32 %v472_v33, %v471_v32 }
 0x3d2   :  { %532 = vpush %v473_v34 }
 0x3fb   :  { %s527_s3 = spop %526 }
 0x3fc   :  { %s529_s4 = spop %528  ;;  %v253_v45 = vstv %s527_s3 }
 0x3fd   :  { %v265_v35 = vstv %s529_s4 }
 0x3fe   :  { %s531_s7 = spop %530 }
 0x3ff   :  { %v463_v46 = vstv %s531_s7 }
 0x400   :  { %v464_v54 = vadd.f32 %v463_v46, %v253_v45 }
 0x403   :  { %s533_s15 = spop %532 }
 0x404   :  { %v475_v36 = vstv %s533_s15 }
 0x405   :  { %v476_v37 = vadd.f32 %v475_v36, %v265_v35 }
 0x407   :  { %v477_v38 = vadd.f32 1e-09, %v476_v37 }
 0x409   :  { %569 = vrcp.f32 %v477_v38  ;;  %v489_v42 = vand.u32 2147483648, %v477_v38  ;;  %v487_v44 = vand.u32 2147483647, %v477_v38  ;;  %vm483_vm1 = vweird.f32 %v477_v38 }
 0x40b   :  { %v490_v48 = vor.u32 1.1754944e-38, %v489_v42  ;;  %vm488_vm3 = vcmp.eq.f32.partialorder %v487_v44, 8.507059e+37 }
 0x40f   :  { %v570_v39 = vpop.eup %569 }
 0x410   :  { %v479_v40 = vmul.f32 %v570_v39, %v477_v38  ;;  %vm484_vm0 = vweird.f32 %v570_v39 }
 0x411   :  { %vm485_vm2 = vmor %vm483_vm1, %vm484_vm0 }
 0x412   :  { %v480_v41 = vsub.f32 1.0, %v479_v40 }
 0x414   :  { %v481_v43 = vmul.f32 %v570_v39, %v480_v41 }
 0x416   :  { %v482_v47 = vadd.f32 %v570_v39, %v481_v43 }
 0x418   :  { %v486_v56 = vsel %vm485_vm2, %v570_v39, %v482_v47 }
 0x419   :  { %v491_v60 = vsel %vm488_vm3, %v490_v48, %v486_v56 }
 0x41a   :  { %v492_v63 = vmul.f32 %v491_v60, %v464_v54 }
 0x41c   :  { %494 = vst.msk [vmem:[#allocation3] sm:$0x1] %vm493_vm4, %v492_v63 }
 0x41d   :  { %505 = dma.vmem_to_hbm [thread:$0]  %s501_s5, 16, %s503_s6, [#allocation4]  }
 0x41e   :  { %595 = dma.done.wait [#allocation4], 16  }
 0x41f   :  { %596 = vsyncadd [#allocation4], 4294967280 }
 0x420   :  { %510 = vsyncpa [#allocation4], 1 }

</bundles_post_ra>
